<compile_context>
chip_gen: v6e
topology: v6e:2x2x1
jax: 0.10.0
libtpu: 0.0.40
codegen_flags: <defaults>
</compile_context>

<pallas_src>
import functools

import jax
import jax.numpy as jnp
import numpy as np
from jax.experimental import pallas as pl
from jax.experimental.pallas import tpu as pltpu

N_STACK = 1
SCORE_THR = 0.8


def _round_up(x, m):
    return ((x + m - 1) // m) * m


# ----------------------------------------------------------------------------
# Hot-path kernel: one (bs-tile, HW-tile) grid step.
#   preds_ref:   (tbs, k, thw)      model heatmaps (native dtype, cast here)
#   targets_ref: (T, tbs, k, thw)   teacher heatmaps
#   out_ref:     (tbs, 3, k) f32    packed [per-joint MSE, v1_score, v2_score]
#   *_acc:       (tbs, k, fold) f32 VMEM scratch, live across the HW axis
# ----------------------------------------------------------------------------
def _main_kernel(preds_ref, targets_ref, out_ref, loss_acc, v1_acc, v2_acc, *,
                 inv_hw, fold):
    hw_id = pl.program_id(1)
    n_hw = pl.num_programs(1)

    @pl.when(hw_id == 0)
    def _():
        loss_acc[...] = jnp.zeros_like(loss_acc)
        v1_acc[...] = jnp.zeros_like(v1_acc)  # softmax scores > 0 -> 0 acts as -inf
        v2_acc[...] = jnp.zeros_like(v2_acc)

    v1 = preds_ref[...].astype(jnp.float32)                  # (tbs, k, thw)

    t_count = targets_ref.shape[0]
    v2 = targets_ref[0].astype(jnp.float32)
    for t in range(1, t_count):                              # static, tiny teacher loop
        v2 = v2 + targets_ref[t].astype(jnp.float32)
    v2 = v2 * (1.0 / t_count)                                # == targets.mean(dim=0)

    thw = v1.shape[-1]
    n_chunks = thw // fold                                   # exact by construction

    # Fold the lane axis thw -> fold with VPU elementwise adds / maxes across
    # 128-aligned chunks; the XLU cross-lane reduce runs once, in the epilogue,
    # instead of once per HW tile (binding unit on v7x where HBM no longer is).
    def fold_sum(x):
        acc = x[..., 0:fold]
        for c in range(1, n_chunks):
            acc = acc + x[..., c * fold:(c + 1) * fold]
        return acc

    def fold_max(x):
        acc = x[..., 0:fold]
        for c in range(1, n_chunks):
            acc = jnp.maximum(acc, x[..., c * fold:(c + 1) * fold])
        return acc

    # Partial (folded) sum of squared error; divide by the *full* HW only at
    # the last tile (dividing per-tile would be wrong).
    d = v1 - v2
    loss_acc[...] += fold_sum(d * d)

    # softmax over joints (axis -2) is per spatial position -> exact under HW
    # tiling; the spatial max becomes a running (folded) max across HW tiles.
    # Kept in f32 (score-vs-threshold compare is precision sensitive).
    def tile_score(x):
        m = jnp.max(x, axis=-2, keepdims=True)
        e = jnp.exp(x - m)
        s = jnp.sum(e, axis=-2, keepdims=True)
        # One exact reciprocal on (tbs,1,thw) + broadcast mul instead of k
        # broadcast divides (exact on purpose: do not perturb the 0.8 mask).
        return fold_max(e * pl.reciprocal(s, approx=False))

    v1_acc[...] = jnp.maximum(v1_acc[...], tile_score(v1))
    v2_acc[...] = jnp.maximum(v2_acc[...], tile_score(v2))

    @pl.when(hw_id == n_hw - 1)
    def _():
        out_ref[:, 0, :] = jnp.sum(loss_acc[...], axis=-1) * inv_hw
        out_ref[:, 1, :] = jnp.max(v1_acc[...], axis=-1)
        out_ref[:, 2, :] = jnp.max(v2_acc[...], axis=-1)


# ----------------------------------------------------------------------------
# Tile / VMEM budgeting (generation-aware, padded-layout-aware).
# ----------------------------------------------------------------------------
def _vmem_capacity_bytes():
    try:
        info = pltpu.get_tpu_info()
        cap = getattr(info, "vmem_capacity_bytes", None)
        if cap:
            return int(cap)
    except Exception:
        pass
    return 64 << 20  # conservative default: v7x per-TensorCore VMEM


def _pick_fold(thw, max_chunks=64):
    if thw % 128 != 0:
        return thw                      # non-128-multiple only when thw == hw
    fold = 128
    while thw // fold > max_chunks and thw % (fold * 2) == 0:
        fold *= 2
    return fold


def _vmem_estimate(tbs, thw, k, T, in_itemsize, fold):
    """Per-grid-step VMEM: double-buffered inputs + double-buffered out block +
    persistent scratch + ~5 live (tbs,k,thw) f32 temporaries, using padded
    sublane/lane sizes (k pads to 8 for f32, 16 for bf16; lanes pad to 128)."""
    sub = 8 * max(1, 4 // in_itemsize)
    k_in = _round_up(k, sub)
    k_f32 = _round_up(k, 8)
    thw_pad = _round_up(thw, 128)
    in_block = (1 + T) * tbs * k_in * thw_pad * in_itemsize
    out_block = tbs * 8 * _round_up(k, 128) * 4          # (tbs, 3->8, k->128) f32
    scratch = 3 * tbs * k_f32 * _round_up(fold, 128) * 4
    temps = 5 * tbs * k_f32 * thw_pad * 4                 # v1, v2, exp, probs, slack
    return 2 * in_block + 2 * out_block + scratch + temps


def _pick_tiles(bs, k, hw, T, in_itemsize, budget):
    # >= 2 blocks on the bs ('parallel') axis so both v7x TensorCores get work;
    # the hw axis is the reduction and cannot be split across cores.
    max_tbs = bs if bs < 2 else bs // 2
    tbs_cands = [d for d in range(max_tbs, 0, -1) if bs % d == 0]
    thw_cands = [hw]
    d = (hw // 128) * 128
    while d >= 128:
        if d != hw and hw % d == 0:
            thw_cands.append(d)
        d -= 128

    best = None                                            # (per_step_elems, thw, tbs)
    for thw in thw_cands:
        fold = _pick_fold(thw)
        for tbs in tbs_cands:                              # descending -> first fit is largest
            if _vmem_estimate(tbs, thw, k, T, in_itemsize, fold) <= budget:
                cand = (tbs * thw, thw, tbs)
                if best is None or cand > best:
                    best = cand
                break
    if best is None:                                       # nothing fits the soft budget
        return tbs_cands[-1], thw_cands[-1]
    return best[2], best[1]


@functools.partial(jax.jit, static_argnames=("score_thr", "tbs", "thw"))
def joint_pseudo_loss(preds, targets, sample_weight, score_thr=SCORE_THR,
                      tbs=None, thw=None):
    """JointPseudoLoss.forward (nStack == 1).

    preds:         (bs, k, H, W)
    targets:       (T, bs, k, H, W)   teacher/aug axis, averaged in-kernel
    sample_weight: (bs,) or (bs, 1)
    Returns (total_loss, num_pseudo, num_selected, joint_score_mean[k]).
    """
    assert N_STACK == 1
    bs, k, H, W = preds.shape
    T = targets.shape[0]
    hw = H * W
    itemsize = jnp.dtype(preds.dtype).itemsize

    vmem_cap = _vmem_capacity_bytes()
    budget = min(32 << 20, (vmem_cap * 3) // 8)            # ~24 MiB on v7x, 32 MiB on v5e/v6e

    if tbs is None or thw is None:
        a_tbs, a_thw = _pick_tiles(bs, k, hw, T, itemsize, budget)
        tbs = a_tbs if tbs is None else tbs
        thw = a_thw if thw is None else thw
    assert bs % tbs == 0, (bs, tbs)
    assert hw % thw == 0 and (thw % 128 == 0 or thw == hw), (hw, thw)
    fold = _pick_fold(thw)

    est = _vmem_estimate(tbs, thw, k, T, itemsize, fold)
    vmem_limit = int(min((vmem_cap * 5) // 8, max(16 << 20, est + (8 << 20))))

    # No dtype upcast here: DMA the model's dtype (e.g. bf16) and cast per-tile
    # inside the kernel -> halves HBM traffic for bf16 inputs.
    preds_r = preds.reshape(bs, k, hw)
    targets_r = targets.reshape(T, bs, k, hw)

    grid = (bs // tbs, hw // thw)
    # TODO(synk): for large T, stream the teacher axis (extra 'arbitrary' grid dim
    # with a running-mean accumulator) so the targets block shrinks to (1,tbs,k,thw).
    # TODO(synk): if producers can emit (k, bs, H, W), retile with k leading to use
    # full sublanes (do NOT add a wrapper-side transpose; it costs an HBM pass).
    packed = pl.pallas_call(
        functools.partial(_main_kernel, inv_hw=1.0 / hw, fold=fold),
        out_shape=jax.ShapeDtypeStruct((bs, 3, k), jnp.float32),
        grid_spec=pltpu.PrefetchScalarGridSpec(
            num_scalar_prefetch=0,
            grid=grid,
            in_specs=[
                pl.BlockSpec((tbs, k, thw), lambda i, j: (i, 0, j)),
                pl.BlockSpec((T, tbs, k, thw), lambda i, j: (0, i, 0, j)),
            ],
            out_specs=pl.BlockSpec((tbs, 3, k), lambda i, j: (i, 0, 0)),
            scratch_shapes=[
                pltpu.VMEM((tbs, k, fold), jnp.float32),
                pltpu.VMEM((tbs, k, fold), jnp.float32),
                pltpu.VMEM((tbs, k, fold), jnp.float32),
            ],
        ),
        compiler_params=pltpu.CompilerParams(
            dimension_semantics=("parallel", "arbitrary"),
            vmem_limit_bytes=vmem_limit,
        ),
    )(preds_r, targets_r)

    mse = packed[:, 0, :]        # (bs, k)  per-(sample, joint) MSE
    v1_score = packed[:, 1, :]   # (bs, k)  max over HW of softmax-over-joints (preds)
    v2_score = packed[:, 2, :]   # (bs, k)  same for averaged targets

    # O(bs*k) finalize in plain JAX (fuses under jit; avoids a second launch).
    sw = sample_weight.reshape(bs, 1).astype(jnp.float32)
    loss = mse * sw                                          # loss.mul(sampleWeight)
    v1_mask = (v1_score >= score_thr).astype(jnp.float32)
    v2_mask = (v2_score >= score_thr).astype(jnp.float32)
    mask = v1_mask * v2_mask

    total = jnp.sum(loss * mask)
    num_pseudo = jnp.sum(loss > 0).astype(jnp.int32)
    num_selected = jnp.sum(mask > 0).astype(jnp.int32)

    unl = (sw > 0).astype(jnp.float32)                       # samples with sw > 0
    # NOTE: max(cnt,1) guard intentionally diverges from PyTorch, which would
    # produce NaN when there are zero unlabeled samples.
    cnt = jnp.maximum(jnp.sum(unl), 1.0)
    joint_score_mean = 0.5 * (jnp.sum(v1_score * unl, axis=0)
                              + jnp.sum(v2_score * unl, axis=0)) / cnt
    return total, num_pseudo, num_selected, joint_score_mean


# ----------------------------------------------------------------------------
# Pure NumPy reference mirroring the PyTorch forward (nStack == 1).
# ----------------------------------------------------------------------------
def _reference(preds, targets, sample_weight, score_thr):
    preds = np.asarray(preds, np.float32)
    targets = np.asarray(targets, np.float32)
    sw = np.asarray(sample_weight, np.float32).reshape(-1, 1)
    bs, k = preds.shape[0], preds.shape[1]

    v1 = preds.reshape(bs, k, -1)
    v2 = targets.mean(0).reshape(bs, k, -1)
    loss = ((v1 - v2) ** 2).mean(-1) * sw

    def softmax(x, axis):
        m = x.max(axis=axis, keepdims=True)
        e = np.exp(x - m)
        return e / e.sum(axis=axis, keepdims=True)

    v1_score = softmax(v1, -2).max(-1)
    v2_score = softmax(v2, -2).max(-1)
    v1_mask = (v1_score >= score_thr).astype(np.float32)
    v2_mask = (v2_score >= score_thr).astype(np.float32)
    mask = v1_mask * v2_mask

    num_pseudo = int((loss.reshape(-1) > 0).sum())
    num_selected = int((mask.reshape(-1) > 0).sum())
    sel = sw.reshape(-1) > 0
    jsm = (v1_score[sel].mean(0) + v2_score[sel].mean(0)) / 2.0
    total = float((loss * mask).sum())
    return total, num_pseudo, num_selected, jsm


def _check(outs, ref):
    total, npseudo, nsel, jsm = outs
    r_total, r_npseudo, r_nsel, r_jsm = ref
    np.testing.assert_allclose(np.asarray(total), r_total, rtol=1e-4, atol=1e-5)
    assert int(npseudo) == r_npseudo, (int(npseudo), r_npseudo)
    assert int(nsel) == r_nsel, (int(nsel), r_nsel)
    np.testing.assert_allclose(np.asarray(jsm), r_jsm, rtol=1e-4, atol=1e-5)


if __name__ == "__main__":
    key = jax.random.PRNGKey(0)
    score_thr = 0.6  # gives a mixed selection mask at these sizes

    # Case 1: bs=16, k=4, 16x16 heatmaps, T=2 teachers.
    bs, k, H, W, T = 16, 4, 16, 16, 2
    ka, kb, kc, kd = jax.random.split(key, 4)
    preds = jax.random.normal(ka, (bs, k, H, W), dtype=jnp.float32)
    targets = jax.random.normal(kb, (T, bs, k, H, W), dtype=jnp.float32)
    sample_weight = jnp.where(jnp.arange(bs) % 4 == 1, 0.0, 1.0)
    sample_weight = sample_weight.reshape(bs, 1).astype(jnp.float32)
    ref1 = _reference(preds, targets, sample_weight, score_thr)

    # Auto-picked tiles (prefers thw == hw, >= 2 bs blocks for megacore).
    outs = jax.block_until_ready(
        joint_pseudo_loss(preds, targets, sample_weight, score_thr=score_thr))
    _check(outs, ref1)

    # Explicit small tiles: exercises the HW (reduction) grid axis accumulators
    # and a tbs that is NOT a multiple of 8 (freed by the (bs,3,k) output layout).
    outs = jax.block_until_ready(
        joint_pseudo_loss(preds, targets, sample_weight, score_thr=score_thr,
                          tbs=4, thw=128))
    _check(outs, ref1)

    # Case 2: odd bs / odd k — no %8 constraint on the bs tile any more.
    bs2, k2, T2 = 6, 3, 2
    preds2 = jax.random.normal(kc, (bs2, k2, H, W), dtype=jnp.float32)
    targets2 = jax.random.normal(kd, (T2, bs2, k2, H, W), dtype=jnp.float32)
    sw2 = jnp.where(jnp.arange(bs2) % 3 == 1, 0.0, 1.0)
    sw2 = sw2.reshape(bs2, 1).astype(jnp.float32)
    ref2 = _reference(preds2, targets2, sw2, score_thr)
    outs2 = jax.block_until_ready(
        joint_pseudo_loss(preds2, targets2, sw2, score_thr=score_thr))
    _check(outs2, ref2)

    # bf16 inputs go through the DMA unconverted (half the HBM traffic) and are
    # cast to f32 per-tile in-kernel; smoke-check only (bf16 quantizes inputs).
    outs_bf16 = jax.block_until_ready(joint_pseudo_loss(
        preds.astype(jnp.bfloat16), targets.astype(jnp.bfloat16), sample_weight,
        score_thr=score_thr, tbs=4, thw=128))
    assert bool(jnp.isfinite(outs_bf16[0]))

    print("KERNEL_OK")
</pallas_src>

<mosaic_0001>
module attributes {stable_mosaic.version = 11 : i64} {
  func.func @_main_kernel(%arg0: i32, %arg1: i32, %arg2: memref<8x4x256xf32, #tpu.memory_space<vmem>>, %arg3: memref<2x8x4x256xf32, #tpu.memory_space<vmem>>, %arg4: memref<8x3x4xf32, #tpu.memory_space<vmem>>, %arg5: memref<8x4x128xf32, #tpu.memory_space<vmem>>, %arg6: memref<8x4x128xf32, #tpu.memory_space<vmem>>, %arg7: memref<8x4x128xf32, #tpu.memory_space<vmem>>) attributes {dimension_semantics = [#tpu.dimension_semantics<parallel>, #tpu.dimension_semantics<arbitrary>], iteration_bounds = array<i64: 2, 1>, scalar_prefetch = 0 : i64, scratch_operands = 3 : i64, tpu.core_type = #tpu.core_type<tc>, window_params = [{transform_indices = @transform_0, window_bounds = array<i64: 8, 4, 256>}, {transform_indices = @transform_1, window_bounds = array<i64: 2, 8, 4, 256>}, {transform_indices = @transform_2, window_bounds = array<i64: 8, 3, 4>}]} {
    %c0_i32 = arith.constant 0 : i32
    %0 = arith.cmpi eq, %arg1, %c0_i32 : i32
    %1 = arith.extui %0 : i1 to i32
    %c0_i32_0 = arith.constant 0 : i32
    %2 = arith.cmpi ne, %1, %c0_i32_0 : i32
    scf.if %2 {
      %cst_34 = arith.constant 0.000000e+00 : f32
      %54 = vector.broadcast %cst_34 : f32 to vector<8x4x128xf32>
      %c0_35 = arith.constant 0 : index
      %c0_36 = arith.constant 0 : index
      %c0_37 = arith.constant 0 : index
      %55 = vector.load %arg5[%c0_35, %c0_36, %c0_37] : memref<8x4x128xf32, #tpu.memory_space<vmem>>, vector<8x4x128xf32>
      tpu.vector_store %arg5[%c0_35, %c0_36, %c0_37], %54 {strides = array<i32>} : memref<8x4x128xf32, #tpu.memory_space<vmem>>, vector<8x4x128xf32>,
      %cst_38 = arith.constant 0.000000e+00 : f32
      %56 = vector.broadcast %cst_38 : f32 to vector<8x4x128xf32>
      %c0_39 = arith.constant 0 : index
      %c0_40 = arith.constant 0 : index
      %c0_41 = arith.constant 0 : index
      %57 = vector.load %arg6[%c0_39, %c0_40, %c0_41] : memref<8x4x128xf32, #tpu.memory_space<vmem>>, vector<8x4x128xf32>
      tpu.vector_store %arg6[%c0_39, %c0_40, %c0_41], %56 {strides = array<i32>} : memref<8x4x128xf32, #tpu.memory_space<vmem>>, vector<8x4x128xf32>,
      %cst_42 = arith.constant 0.000000e+00 : f32
      %58 = vector.broadcast %cst_42 : f32 to vector<8x4x128xf32>
      %c0_43 = arith.constant 0 : index
      %c0_44 = arith.constant 0 : index
      %c0_45 = arith.constant 0 : index
      %59 = vector.load %arg7[%c0_43, %c0_44, %c0_45] : memref<8x4x128xf32, #tpu.memory_space<vmem>>, vector<8x4x128xf32>
      tpu.vector_store %arg7[%c0_43, %c0_44, %c0_45], %58 {strides = array<i32>} : memref<8x4x128xf32, #tpu.memory_space<vmem>>, vector<8x4x128xf32>,
    } else {
    }
    %c0 = arith.constant 0 : index
    %c0_1 = arith.constant 0 : index
    %c0_2 = arith.constant 0 : index
    %3 = vector.load %arg2[%c0, %c0_1, %c0_2] : memref<8x4x256xf32, #tpu.memory_space<vmem>>, vector<8x4x256xf32>
    %c0_3 = arith.constant 0 : index
    %c0_4 = arith.constant 0 : index
    %c0_5 = arith.constant 0 : index
    %c0_6 = arith.constant 0 : index
    %4 = vector.load %arg3[%c0_3, %c0_4, %c0_5, %c0_6] : memref<2x8x4x256xf32, #tpu.memory_space<vmem>>, vector<1x8x4x256xf32>
    %5 = vector.shape_cast %4 : vector<1x8x4x256xf32> to vector<8x4x256xf32>
    %c1 = arith.constant 1 : index
    %c0_7 = arith.constant 0 : index
    %c0_8 = arith.constant 0 : index
    %c0_9 = arith.constant 0 : index
    %6 = vector.load %arg3[%c1, %c0_7, %c0_8, %c0_9] : memref<2x8x4x256xf32, #tpu.memory_space<vmem>>, vector<1x8x4x256xf32>
    %7 = vector.shape_cast %6 : vector<1x8x4x256xf32> to vector<8x4x256xf32>
    %8 = arith.addf %5, %7 : vector<8x4x256xf32>
    %cst = arith.constant 5.000000e-01 : f32
    %9 = vector.broadcast %cst : f32 to vector<8x4x256xf32>
    %10 = arith.mulf %8, %9 : vector<8x4x256xf32>
    %11 = arith.subf %3, %10 : vector<8x4x256xf32>
    %c0_10 = arith.constant 0 : index
    %c0_11 = arith.constant 0 : index
    %c0_12 = arith.constant 0 : index
    %12 = vector.load %arg5[%c0_10, %c0_11, %c0_12] : memref<8x4x128xf32, #tpu.memory_space<vmem>>, vector<8x4x128xf32>
    %13 = arith.mulf %11, %11 : vector<8x4x256xf32>
    %14 = vector.extract_strided_slice %13 {offsets = [0, 0, 0], sizes = [8, 4, 128], strides = [1, 1, 1]} : vector<8x4x256xf32> to vector<8x4x128xf32>
    %15 = vector.extract_strided_slice %13 {offsets = [0, 0, 128], sizes = [8, 4, 128], strides = [1, 1, 1]} : vector<8x4x256xf32> to vector<8x4x128xf32>
    %16 = arith.addf %14, %15 : vector<8x4x128xf32>
    %17 = arith.addf %12, %16 : vector<8x4x128xf32>
    %c0_13 = arith.constant 0 : index
    %c0_14 = arith.constant 0 : index
    %c0_15 = arith.constant 0 : index
    %18 = vector.load %arg5[%c0_13, %c0_14, %c0_15] : memref<8x4x128xf32, #tpu.memory_space<vmem>>, vector<8x4x128xf32>
    tpu.vector_store %arg5[%c0_13, %c0_14, %c0_15], %17 {strides = array<i32>} : memref<8x4x128xf32, #tpu.memory_space<vmem>>, vector<8x4x128xf32>,
    %c0_16 = arith.constant 0 : index
    %c0_17 = arith.constant 0 : index
    %c0_18 = arith.constant 0 : index
    %19 = vector.load %arg6[%c0_16, %c0_17, %c0_18] : memref<8x4x128xf32, #tpu.memory_space<vmem>>, vector<8x4x128xf32>
    %cst_19 = arith.constant dense<0xFF800000> : vector<8x256xf32>
    %20 = vector.multi_reduction <maximumf>, %3, %cst_19 [1] : vector<8x4x256xf32> to vector<8x256xf32>
    %21 = vector.shape_cast %20 : vector<8x256xf32> to vector<8x1x256xf32>
    %22 = vector.broadcast %21 : vector<8x1x256xf32> to vector<8x4x256xf32>
    %23 = arith.subf %3, %22 : vector<8x4x256xf32>
    %24 = math.exp %23 : vector<8x4x256xf32>
    %cst_20 = arith.constant dense<0.000000e+00> : vector<8x256xf32>
    %25 = vector.multi_reduction <add>, %24, %cst_20 [1] : vector<8x4x256xf32> to vector<8x256xf32>
    %26 = vector.shape_cast %25 : vector<8x256xf32> to vector<8x1x256xf32>
    %27 = tpu.reciprocal %26 : vector<8x1x256xf32> -> vector<8x1x256xf32>
    %28 = vector.broadcast %27 : vector<8x1x256xf32> to vector<8x4x256xf32>
    %29 = arith.mulf %24, %28 : vector<8x4x256xf32>
    %30 = vector.extract_strided_slice %29 {offsets = [0, 0, 0], sizes = [8, 4, 128], strides = [1, 1, 1]} : vector<8x4x256xf32> to vector<8x4x128xf32>
    %31 = vector.extract_strided_slice %29 {offsets = [0, 0, 128], sizes = [8, 4, 128], strides = [1, 1, 1]} : vector<8x4x256xf32> to vector<8x4x128xf32>
    %32 = arith.maximumf %30, %31 : vector<8x4x128xf32>
    %33 = arith.maximumf %19, %32 : vector<8x4x128xf32>
    %c0_21 = arith.constant 0 : index
    %c0_22 = arith.constant 0 : index
    %c0_23 = arith.constant 0 : index
    %34 = vector.load %arg6[%c0_21, %c0_22, %c0_23] : memref<8x4x128xf32, #tpu.memory_space<vmem>>, vector<8x4x128xf32>
    tpu.vector_store %arg6[%c0_21, %c0_22, %c0_23], %33 {strides = array<i32>} : memref<8x4x128xf32, #tpu.memory_space<vmem>>, vector<8x4x128xf32>,
    %c0_24 = arith.constant 0 : index
    %c0_25 = arith.constant 0 : index
    %c0_26 = arith.constant 0 : index
    %35 = vector.load %arg7[%c0_24, %c0_25, %c0_26] : memref<8x4x128xf32, #tpu.memory_space<vmem>>, vector<8x4x128xf32>
    %cst_27 = arith.constant dense<0xFF800000> : vector<8x256xf32>
    %36 = vector.multi_reduction <maximumf>, %10, %cst_27 [1] : vector<8x4x256xf32> to vector<8x256xf32>
    %37 = vector.shape_cast %36 : vector<8x256xf32> to vector<8x1x256xf32>
    %38 = vector.broadcast %37 : vector<8x1x256xf32> to vector<8x4x256xf32>
    %39 = arith.subf %10, %38 : vector<8x4x256xf32>
    %40 = math.exp %39 : vector<8x4x256xf32>
    %cst_28 = arith.constant dense<0.000000e+00> : vector<8x256xf32>
    %41 = vector.multi_reduction <add>, %40, %cst_28 [1] : vector<8x4x256xf32> to vector<8x256xf32>
    %42 = vector.shape_cast %41 : vector<8x256xf32> to vector<8x1x256xf32>
    %43 = tpu.reciprocal %42 : vector<8x1x256xf32> -> vector<8x1x256xf32>
    %44 = vector.broadcast %43 : vector<8x1x256xf32> to vector<8x4x256xf32>
    %45 = arith.mulf %40, %44 : vector<8x4x256xf32>
    %46 = vector.extract_strided_slice %45 {offsets = [0, 0, 0], sizes = [8, 4, 128], strides = [1, 1, 1]} : vector<8x4x256xf32> to vector<8x4x128xf32>
    %47 = vector.extract_strided_slice %45 {offsets = [0, 0, 128], sizes = [8, 4, 128], strides = [1, 1, 1]} : vector<8x4x256xf32> to vector<8x4x128xf32>
    %48 = arith.maximumf %46, %47 : vector<8x4x128xf32>
    %49 = arith.maximumf %35, %48 : vector<8x4x128xf32>
    %c0_29 = arith.constant 0 : index
    %c0_30 = arith.constant 0 : index
    %c0_31 = arith.constant 0 : index
    %50 = vector.load %arg7[%c0_29, %c0_30, %c0_31] : memref<8x4x128xf32, #tpu.memory_space<vmem>>, vector<8x4x128xf32>
    tpu.vector_store %arg7[%c0_29, %c0_30, %c0_31], %49 {strides = array<i32>} : memref<8x4x128xf32, #tpu.memory_space<vmem>>, vector<8x4x128xf32>,
    %c0_i32_32 = arith.constant 0 : i32
    %51 = arith.cmpi eq, %arg1, %c0_i32_32 : i32
    %52 = arith.extui %51 : i1 to i32
    %c0_i32_33 = arith.constant 0 : i32
    %53 = arith.cmpi ne, %52, %c0_i32_33 : i32
    scf.if %53 {
      %c0_34 = arith.constant 0 : index
      %c0_35 = arith.constant 0 : index
      %c0_36 = arith.constant 0 : index
      %54 = vector.load %arg5[%c0_34, %c0_35, %c0_36] : memref<8x4x128xf32, #tpu.memory_space<vmem>>, vector<8x4x128xf32>
      %cst_37 = arith.constant dense<0.000000e+00> : vector<8x4xf32>
      %55 = vector.multi_reduction <add>, %54, %cst_37 [2] : vector<8x4x128xf32> to vector<8x4xf32>
      %cst_38 = arith.constant 3.906250e-03 : f32
      %56 = vector.broadcast %cst_38 : f32 to vector<8x4xf32>
      %57 = arith.mulf %55, %56 : vector<8x4xf32>
      %c0_39 = arith.constant 0 : index
      %c0_40 = arith.constant 0 : index
      %c0_41 = arith.constant 0 : index
      %58 = vector.load %arg4[%c0_39, %c0_40, %c0_41] : memref<8x3x4xf32, #tpu.memory_space<vmem>>, vector<8x1x4xf32>
      %59 = vector.shape_cast %58 : vector<8x1x4xf32> to vector<8x4xf32>
      %60 = vector.shape_cast %57 : vector<8x4xf32> to vector<8x1x4xf32>
      tpu.vector_store %arg4[%c0_39, %c0_40, %c0_41], %60 {strides = array<i32>} : memref<8x3x4xf32, #tpu.memory_space<vmem>>, vector<8x1x4xf32>,
      %c0_42 = arith.constant 0 : index
      %c0_43 = arith.constant 0 : index
      %c0_44 = arith.constant 0 : index
      %61 = vector.load %arg6[%c0_42, %c0_43, %c0_44] : memref<8x4x128xf32, #tpu.memory_space<vmem>>, vector<8x4x128xf32>
      %cst_45 = arith.constant dense<0xFF800000> : vector<8x4xf32>
      %62 = vector.multi_reduction <maximumf>, %61, %cst_45 [2] : vector<8x4x128xf32> to vector<8x4xf32>
      %c0_46 = arith.constant 0 : index
      %c1_47 = arith.constant 1 : index
      %c0_48 = arith.constant 0 : index
      %63 = vector.load %arg4[%c0_46, %c1_47, %c0_48] : memref<8x3x4xf32, #tpu.memory_space<vmem>>, vector<8x1x4xf32>
      %64 = vector.shape_cast %63 : vector<8x1x4xf32> to vector<8x4xf32>
      %65 = vector.shape_cast %62 : vector<8x4xf32> to vector<8x1x4xf32>
      tpu.vector_store %arg4[%c0_46, %c1_47, %c0_48], %65 {strides = array<i32>} : memref<8x3x4xf32, #tpu.memory_space<vmem>>, vector<8x1x4xf32>,
      %c0_49 = arith.constant 0 : index
      %c0_50 = arith.constant 0 : index
      %c0_51 = arith.constant 0 : index
      %66 = vector.load %arg7[%c0_49, %c0_50, %c0_51] : memref<8x4x128xf32, #tpu.memory_space<vmem>>, vector<8x4x128xf32>
      %cst_52 = arith.constant dense<0xFF800000> : vector<8x4xf32>
      %67 = vector.multi_reduction <maximumf>, %66, %cst_52 [2] : vector<8x4x128xf32> to vector<8x4xf32>
      %c0_53 = arith.constant 0 : index
      %c2 = arith.constant 2 : index
      %c0_54 = arith.constant 0 : index
      %68 = vector.load %arg4[%c0_53, %c2, %c0_54] : memref<8x3x4xf32, #tpu.memory_space<vmem>>, vector<8x1x4xf32>
      %69 = vector.shape_cast %68 : vector<8x1x4xf32> to vector<8x4xf32>
      %70 = vector.shape_cast %67 : vector<8x4xf32> to vector<8x1x4xf32>
      tpu.vector_store %arg4[%c0_53, %c2, %c0_54], %70 {strides = array<i32>} : memref<8x3x4xf32, #tpu.memory_space<vmem>>, vector<8x1x4xf32>,
    } else {
    }
    return
  }
  func.func @transform_0(%arg0: i32, %arg1: i32) -> (i32, i32, i32) {
    %c0_i32 = arith.constant 0 : i32
    %c0_i32_0 = arith.constant 0 : i32
    return %arg0, %c0_i32, %arg1 : i32, i32, i32
  }
  func.func @transform_1(%arg0: i32, %arg1: i32) -> (i32, i32, i32, i32) {
    %c0_i32 = arith.constant 0 : i32
    %c0_i32_0 = arith.constant 0 : i32
    %c0_i32_1 = arith.constant 0 : i32
    return %c0_i32, %arg0, %c0_i32_0, %arg1 : i32, i32, i32, i32
  }
  func.func @transform_2(%arg0: i32, %arg1: i32) -> (i32, i32, i32) {
    %c0_i32 = arith.constant 0 : i32
    %c0_i32_0 = arith.constant 0 : i32
    %c0_i32_1 = arith.constant 0 : i32
    return %arg0, %c0_i32, %c0_i32_0 : i32, i32, i32
  }
}

</mosaic_0001>

<bundles_post_ra>
// kernel: joint_pseudo_loss.1
= control target key start
LH: loop header
LB: loop body
LE: loop exit
PB: predicated region body
PF: predicated region fallthrough
CT: control target
= control target key end

     0   :  { %s1922_s9 = smov 0   ;;  %s1924_s10 = smov 0   ;;  %s2427_s0 = inlined_call_operand.vmem [shape: f32[16,4,256], index: 0, kind: input, shape index: {}]   ;;  %s2428_s1 = inlined_call_operand.vmem [shape: f32[2,16,4,256], index: 1, kind: input, shape index: {}]   ;;  %s2429_s2 = inlined_call_operand.vmem [shape: f32[16,3,4], index: 2, kind: output, shape index: {}]  }
   0x1   :  { %s1926_s11 = smov 0   ;;  %s1928_s12 = smov 0  }
   0x2   :  { %s1930_s13 = smov 0  }
   0x3 LB: > { %s24_s14 = sadd.s32 1, %s1900_s12  ;;  %p68_p1 = scmp.ne.s32.totalorder %s1892_s10, %s1888_s9  ;;  %s1904_s13 = sphi %s1930_s13, %s12_s13   ;;  %s1900_s12 = sphi %s1928_s12, %s2434_s12   ;;  %s1896_s11 = sphi %s1926_s11, %s2433_s11   ;;  %s1892_s10 = sphi %s1924_s10, %s2432_s10   ;;  %s1888_s9 = sphi %s1922_s9, %s2431_s9  }
   0x4   : > { %p26_p0 = scmp.ge.s32.totalorder %s24_s14, 2  ;;  %p69_p2 = scmp.eq.s32.totalorder %s1904_s13, 0 }
   0x5   : > { %s61_s16 = sadd.s32 1, %s1892_s10  ;;  %p1696_p5 = scmp.ge.s32.totalorder %s1904_s13, 2 }
   0x6   : > { %s2436_s14 = smov (%p26_p0, %s24_s14), 0  ;;  %p70_p3 = por %p69_p2, %p68_p1 }
   0x7   : > { %s56_s15 = ssub.s32 %s1900_s12, %s2436_s14  ;;  %120 = sbr.rel (%p1696_p5) target bundleno = 24 (0x18), region = 16 }
   0x8   : > { %p59_p4 = scmp.eq.s32.totalorder %s56_s15, 0 }
   0xa   : > { %s1957_s17 = scalar_select %p59_p4, %s1892_s10, %s61_s16  }
   0xc   : > { %138 = sbr.rel (!%p70_p3) target bundleno = 24 (0x18), region = 24  ;;  %s140_s18 = sand.u32 (%p70_p3), 1, %s1892_s10  }
   0xd   : > { %s1719_s19 = sshll.u32 (%p70_p3), %s1900_s12, 6  ;;  %s1697_s20 = sshll.u32 (%p70_p3), %s140_s18, 7 }
   0xe   : > { %s1965_s23 = scalar_lea.vmem (%p70_p3), %s2428_s1, %s1719_s19  ;;  %s142_s24 = scalar_lea.vmem (%p70_p3), [#allocation5], %s1697_s20 }
   0xf   : > { %v207_v0 = vld [vmem:[%s1965_s23] sm:$0xff] (%p70_p3)  ;;  %v209_v1 = vld [vmem:[%s1965_s23 + $0x8] sm:$0xff] (%p70_p3)  ;;  %v211_v2 = vld [vmem:[%s1965_s23 + $0x10] sm:$0xff] (%p70_p3) }
  0x10   : > { %208 = vst [vmem:[%s142_s24] sm:$0xff] (%p70_p3), %v207_v0  ;;  %210 = vst [vmem:[%s142_s24 + $0x8] sm:$0xff] (%p70_p3), %v209_v1  ;;  %v213_v3 = vld [vmem:[%s1965_s23 + $0x18] sm:$0xff] (%p70_p3)  ;;  %v215_v4 = vld [vmem:[%s1965_s23 + $0x20] sm:$0xff] (%p70_p3) }
  0x11   : > { %212 = vst [vmem:[%s142_s24 + $0x10] sm:$0xff] %v211_v2  ;;  %v217_v5 = vld [vmem:[%s1965_s23 + $0x28] sm:$0xff]  ;;  %214 = vst [vmem:[%s142_s24 + $0x18] sm:$0xff] %v213_v3  ;;  %v219_v6 = vld [vmem:[%s1965_s23 + $0x30] sm:$0xff] }
  0x12   : > { %216 = vst [vmem:[%s142_s24 + $0x20] sm:$0xff] %v215_v4  ;;  %218 = vst [vmem:[%s142_s24 + $0x28] sm:$0xff] %v217_v5  ;;  %v221_v7 = vld [vmem:[%s1965_s23 + $0x38] sm:$0xff]  ;;  %v223_v8 = vld [vmem:[%s1965_s23 + $0x80] sm:$0xff] }
  0x13   : > { %220 = vst [vmem:[%s142_s24 + $0x30] sm:$0xff] %v219_v6  ;;  %222 = vst [vmem:[%s142_s24 + $0x38] sm:$0xff] %v221_v7  ;;  %v225_v9 = vld [vmem:[%s1965_s23 + $0x88] sm:$0xff]  ;;  %v227_v10 = vld [vmem:[%s1965_s23 + $0x90] sm:$0xff] }
  0x14   : > { %224 = vst [vmem:[%s142_s24 + $0x40] sm:$0xff] %v223_v8  ;;  %v229_v11 = vld [vmem:[%s1965_s23 + $0x98] sm:$0xff]  ;;  %226 = vst [vmem:[%s142_s24 + $0x48] sm:$0xff] %v225_v9  ;;  %v231_v12 = vld [vmem:[%s1965_s23 + $0xa0] sm:$0xff] }
  0x15   : > { %228 = vst [vmem:[%s142_s24 + $0x50] sm:$0xff] %v227_v10  ;;  %230 = vst [vmem:[%s142_s24 + $0x58] sm:$0xff] %v229_v11  ;;  %v233_v13 = vld [vmem:[%s1965_s23 + $0xa8] sm:$0xff]  ;;  %v235_v14 = vld [vmem:[%s1965_s23 + $0xb0] sm:$0xff] }
  0x16   : > { %232 = vst [vmem:[%s142_s24 + $0x60] sm:$0xff] %v231_v12  ;;  %234 = vst [vmem:[%s142_s24 + $0x68] sm:$0xff] %v233_v13  ;;  %v237_v15 = vld [vmem:[%s1965_s23 + $0xb8] sm:$0xff] }
  0x17   : > { %236 = vst [vmem:[%s142_s24 + $0x70] sm:$0xff] %v235_v14  ;;  %238 = vst [vmem:[%s142_s24 + $0x78] sm:$0xff] %v237_v15 }
  0x18 PF: > { %p1701_p6 = scmp.ge.s32.totalorder %s1904_s13, 1  ;;  %p243_p7 = scmp.lt.s32.totalorder %s1904_s13, 3 }
  0x1a   : > { %p244_p8 = pnand %p1701_p6, %p243_p7 }
  0x1b   : > { %s250_s25 = sand.u32 (!%p244_p8), 1, %s1888_s9   ;;  %s1703_s26 = sshll.u32 (!%p244_p8), %s1896_s11, 3 }
  0x1c   : > { %247 = sbr.rel (%p244_p8) target bundleno = 396 (0x18c), region = 62  ;;  %s1702_s27 = sshll.u32 (!%p244_p8), %s250_s25, 7 }
  0x1d   : > { %p1987_p9 = scmp.lt.s32.totalorder (!%p244_p8), %s1703_s26, 15  ;;  %s1995_s29 = scalar_lea.vmem (!%p244_p8), [#allocation5], %s1702_s27 }
  0x21   : > { %v1906_v16 = vmov 0.0   ;;  %s2438_s26 = smov (!%p1987_p9, %s1703_s26), 15  ;;  %v339_v17 = vld [vmem:[%s1995_s29 + $0x10] sm:$0xff]  ;;  %v337_v19 = vld [vmem:[%s1995_s29] sm:$0xff]  ;;  %v340_v22 = vld [vmem:[%s1995_s29 + $0x18] sm:$0xff]  ;;  %vm474_vm0 = vcmask 1043456  }
  0x22   : > { %307 = vst [vmem:[#allocation2 + $0x8] sm:$0xf] %v1906_v16  ;;  %305 = vst [vmem:[#allocation2] sm:$0xf] %v1906_v16  ;;  %v1710_v18 = vld [vmem:[%s1995_s29 + $0x50] sm:$0xff]  ;;  %v1708_v21 = vld [vmem:[%s1995_s29 + $0x40] sm:$0xff] }
  0x23   : > { %306 = vst [vmem:[#allocation2 + $0x4] sm:$0xf] %v1906_v16  ;;  %308 = vst [vmem:[#allocation2 + $0xc] sm:$0xf] %v1906_v16  ;;  %v356_v20 = vadd.f32 %v1710_v18, %v339_v17  ;;  %v1711_v23 = vld [vmem:[%s1995_s29 + $0x58] sm:$0xff]  ;;  %s1720_s30 = sshll.u32 %s2438_s26, 3  ;;  %v354_v24 = vadd.f32 %v1708_v21, %v337_v19 }
  0x24   : > { %309 = vst [vmem:[#allocation2 + $0x10] sm:$0xf] %v1906_v16  ;;  %310 = vst [vmem:[#allocation2 + $0x14] sm:$0xf] %v1906_v16  ;;  %v357_v25 = vadd.f32 %v1711_v23, %v340_v22  ;;  %v338_v26 = vld [vmem:[%s1995_s29 + $0x8] sm:$0xff]  ;;  %s2010_s5 = scalar_lea.vmem %s2427_s0, %s1720_s30  ;;  %v341_v32 = vld [vmem:[%s1995_s29 + $0x20] sm:$0xff] }
  0x25   : > { %311 = vst [vmem:[#allocation2 + $0x18] sm:$0xf] %v1906_v16  ;;  %312 = vst [vmem:[#allocation2 + $0x1c] sm:$0xf] %v1906_v16  ;;  %v1709_v27 = vld [vmem:[%s1995_s29 + $0x48] sm:$0xff]  ;;  %v2012_v29 = vmul.f32 0.5, %v356_v20 }
  0x26   : > { %313 = vst [vmem:[#allocation3] sm:$0xf] %v1906_v16  ;;  %314 = vst [vmem:[#allocation3 + $0x4] sm:$0xf] %v1906_v16  ;;  %v342_v28 = vld [vmem:[%s1995_s29 + $0x28] sm:$0xff]  ;;  %v2014_v30 = vadd.f32 %v1709_v27, %v338_v26  ;;  %v1712_v33 = vld [vmem:[%s1995_s29 + $0x60] sm:$0xff] }
  0x27   : > { %315 = vst [vmem:[#allocation3 + $0x8] sm:$0xf] %v1906_v16  ;;  %316 = vst [vmem:[#allocation3 + $0xc] sm:$0xf] %v1906_v16  ;;  %v1713_v31 = vld [vmem:[%s1995_s29 + $0x68] sm:$0xff]  ;;  %v2020_v34 = vld [vmem:[%s2010_s5 + $0x10] sm:$0xff]  ;;  %v2031_v39 = vadd.f32 %v1712_v33, %v341_v32  ;;  %v901_v43 = vcombine.high %v2012_v29, %v2012_v29 }
  0x28   : > { %317 = vst [vmem:[#allocation3 + $0x10] sm:$0xf] %v1906_v16  ;;  %318 = vst [vmem:[#allocation3 + $0x14] sm:$0xf] %v1906_v16  ;;  %v2023_v35 = vld [vmem:[%s2010_s5] sm:$0xff]  ;;  %v2025_v36 = vmul.f32 0.5, %v354_v24  ;;  %v2029_v38 = vadd.f32 %v1713_v31, %v342_v28  ;;  %v372_v40 = vsub.f32 %v2020_v34, %v2012_v29  ;;  %v460_v41 = vcombine.high %v2020_v34, %v2020_v34 }
  0x29   : > { %319 = vst [vmem:[#allocation3 + $0x18] sm:$0xf] %v1906_v16  ;;  %320 = vst [vmem:[#allocation3 + $0x1c] sm:$0xf] %v1906_v16  ;;  %v2027_v37 = vmul.f32 0.5, %v357_v25  ;;  %v503_v42 = vsel %vm474_vm0, %v2020_v34, -inf  ;;  %v458_v47 = vcombine.high %v2023_v35, %v2023_v35 }
  0x2a   : > { %321 = vst [vmem:[#allocation4] sm:$0xf] %v1906_v16  ;;  %322 = vst [vmem:[#allocation4 + $0x4] sm:$0xf] %v1906_v16  ;;  %v504_v44 = vrot.slane %v503_v42, 4  ;;  %v943_v45 = vsel %vm474_vm0, %v2012_v29, -inf  ;;  %v370_v46 = vsub.f32 %v2023_v35, %v2025_v36  ;;  %v388_v48 = vmul.f32 %v372_v40, %v372_v40 }
  0x2b   : > { %323 = vst [vmem:[#allocation4 + $0x8] sm:$0xf] %v1906_v16  ;;  %324 = vst [vmem:[#allocation4 + $0xc] sm:$0xf] %v1906_v16  ;;  %v510_v49 = vsel %vm474_vm0, %v460_v41, -inf  ;;  %v944_v50 = vrot.slane %v943_v45, 4  ;;  %v899_v21 = vcombine.high %v2025_v36, %v2025_v36 }
  0x2c   : > { %325 = vst [vmem:[#allocation4 + $0x10] sm:$0xf] %v1906_v16  ;;  %326 = vst [vmem:[#allocation4 + $0x14] sm:$0xf] %v1906_v16  ;;  %v950_v51 = vsel %vm474_vm0, %v901_v43, -inf  ;;  %v505_v52 = vmax.f32 %v503_v42, %v504_v44  ;;  %v511_v53 = vrot.slane %v510_v49, 4  ;;  %v386_v55 = vmul.f32 %v370_v46, %v370_v46 }
  0x2d   : > { %327 = vst [vmem:[#allocation4 + $0x18] sm:$0xf] %v1906_v16  ;;  %328 = vst [vmem:[#allocation4 + $0x1c] sm:$0xf] %v1906_v16  ;;  %v951_v54 = vrot.slane %v950_v51, 4  ;;  %v404_v56 = vrot.slane %v388_v48, 4  ;;  %v945_v57 = vmax.f32 %v943_v45, %v944_v50 }
  0x2e   : > { %v475_v58 = vsel %vm474_vm0, %v2023_v35, -inf  ;;  %v482_v59 = vsel %vm474_vm0, %v458_v47, -inf  ;;  %v380_v60 = vld [vmem:[#allocation2 + $0x8] sm:$0xf]  ;;  %v506_v61 = vrot.slane %v505_v52, 2  ;;  %v512_v62 = vmax.f32 %v510_v49, %v511_v53  ;;  %v2057_v32 = vld [vmem:[%s2010_s5 + $0x18] sm:$0xff] }
  0x2f   : > { %v952_v63 = vmax.f32 %v950_v51, %v951_v54  ;;  %v402_v0 = vrot.slane %v386_v55, 4  ;;  %v420_v1 = vadd.f32 %v404_v56, %v388_v48  ;;  %v946_v2 = vrot.slane %v945_v57, 2  ;;  %v378_v3 = vld [vmem:[#allocation2] sm:$0xf]  ;;  %s1707_s6 = sshll.u32 %s2438_s26, 2 }
  0x30   : > { %v476_v4 = vrot.slane %v475_v58, 4  ;;  %v483_v5 = vrot.slane %v482_v59, 4  ;;  %v507_v6 = vmax.f32 %v505_v52, %v506_v61  ;;  %v513_v7 = vrot.slane %v512_v62, 2  ;;  %s2327_s9 = scalar_lea.vmem %s2429_s2, %s1707_s6 }
  0x31   : > { %v953_v8 = vrot.slane %v952_v63, 2  ;;  %v418_v9 = vadd.f32 %v402_v0, %v386_v55  ;;  %v428_v10 = vadd.f32 %v420_v1, %v380_v60  ;;  %v947_v11 = vmax.f32 %v945_v57, %v946_v2  ;;  %v381_v1 = vld [vmem:[#allocation2 + $0xc] sm:$0xf] }
  0x32   : > { %v477_v12 = vmax.f32 %v475_v58, %v476_v4  ;;  %v484_v13 = vmax.f32 %v482_v59, %v483_v5  ;;  %v508_v14 = vrot.slane %v507_v6, 1  ;;  %v514_v15 = vmax.f32 %v512_v62, %v513_v7 }
  0x33   : > { %v954_v16 = vmax.f32 %v952_v63, %v953_v8  ;;  %v426_v17 = vadd.f32 %v418_v9, %v378_v3  ;;  %436 = vst [vmem:[#allocation2 + $0x8] sm:$0xf] %v428_v10  ;;  %v948_v18 = vrot.slane %v947_v11, 1  ;;  %v915_v25 = vsel %vm474_vm0, %v2025_v36, -inf }
  0x34   : > { %v478_v19 = vrot.slane %v477_v12, 2  ;;  %v485_v20 = vrot.slane %v484_v13, 2  ;;  %v509_v22 = vmax.f32 %v507_v6, %v508_v14  ;;  %v515_v23 = vrot.slane %v514_v15, 1  ;;  %v2075_v14 = vld [vmem:[%s2010_s5 + $0x8] sm:$0xff] }
  0x35   : > { %v955_v24 = vrot.slane %v954_v16, 1  ;;  %434 = vst [vmem:[#allocation2] sm:$0xf] %v426_v17  ;;  %v949_v26 = vmax.f32 %v947_v11, %v948_v18  ;;  %v916_v31 = vrot.slane %v915_v25, 4  ;;  %v922_v41 = vsel %vm474_vm0, %v899_v21, -inf }
  0x36   : > { %v479_v27 = vmax.f32 %v477_v12, %v478_v19  ;;  %v486_v28 = vmax.f32 %v484_v13, %v485_v20  ;;  %v516_v33 = vmax.f32 %v514_v15, %v515_v23  ;;  %v373_v42 = vsub.f32 %v2057_v32, %v2027_v37 }
  0x37   : > { %v956_v40 = vmax.f32 %v954_v16, %v955_v24  ;;  %v917_v45 = vmax.f32 %v915_v25, %v916_v31  ;;  %v923_v46 = vrot.slane %v922_v41, 4  ;;  %v461_v50 = vcombine.high %v2057_v32, %v2057_v32 }
  0x38   : > { %v480_v43 = vrot.slane %v479_v27, 1  ;;  %v487_v44 = vrot.slane %v486_v28, 1  ;;  %v605_v47 = vcombine.low %v509_v22, %v516_v33  ;;  %v389_v49 = vmul.f32 %v373_v42, %v373_v42 }
  0x39   : > { %v1045_v48 = vcombine.low %v949_v26, %v956_v40  ;;  %v918_v53 = vrot.slane %v917_v45, 2  ;;  %v924_v54 = vmax.f32 %v922_v41, %v923_v46  ;;  %v517_v59 = vsel %vm474_vm0, %v2057_v32, -inf }
  0x3a   : > { %v481_v51 = vmax.f32 %v479_v27, %v480_v43  ;;  %v488_v52 = vmax.f32 %v486_v28, %v487_v44  ;;  %v621_v55 = vsub.f32 %v2020_v34, %v605_v47  ;;  %v1328_v57 = vld [vmem:[#allocation2 + $0x8] sm:$0xf]  ;;  %v405_v58 = vrot.slane %v389_v49, 4 }
  0x3b   : > { %v1061_v56 = vsub.f32 %v2012_v29, %v1045_v48  ;;  %v1340_v60 = vsel %vm474_vm0, %v1328_v57, 0.0  ;;  %v919_v62 = vmax.f32 %v917_v45, %v918_v53  ;;  %v925_v63 = vrot.slane %v924_v54, 2 }
  0x3c   : > { %v603_v61 = vcombine.low %v481_v51, %v488_v52  ;;  %v1326_v0 = vld [vmem:[#allocation2] sm:$0xf]  ;;  %v631_v2 = vmul.f32 1.442695, %v621_v55  ;;  %1341 = vadd.xlane.f32.xlu1 %v1340_v60  ;;  %v421_v4 = vadd.f32 %v405_v58, %v389_v49  ;;  %v518_v7 = vrot.slane %v517_v59, 4 }
  0x3d   : > { %v1071_v3 = vmul.f32 1.442695, %v1061_v56  ;;  %v1334_v34 = vsel %vm474_vm0, %v1326_v0, 0.0  ;;  %v920_v5 = vrot.slane %v919_v62, 1  ;;  %v926_v6 = vmax.f32 %v924_v54, %v925_v63 }
  0x3e   : > { %v619_v29 = vsub.f32 %v2023_v35, %v603_v61  ;;  %1335 = vadd.xlane.f32.xlu0 %v1334_v34  ;;  %1770 = vpow2.f32 %v631_v2  ;;  %v429_v8 = vadd.f32 %v421_v4, %v381_v1  ;;  %v524_v9 = vsel %vm474_vm0, %v461_v50, -inf }
  0x3f   : > { %v902_v10 = vcombine.high %v2027_v37, %v2027_v37  ;;  %1772 = vpow2.f32 %v1071_v3  ;;  %v921_v12 = vmax.f32 %v919_v62, %v920_v5  ;;  %v927_v13 = vrot.slane %v926_v6, 1 }
  0x40   : > { %v627_v11 = vmul.f32 1.442695, %v619_v29  ;;  %437 = vst [vmem:[#allocation2 + $0xc] sm:$0xf] %v429_v8  ;;  %v519_v15 = vmax.f32 %v517_v59, %v518_v7  ;;  %v525_v35 = vrot.slane %v524_v9, 4  ;;  %v957_v16 = vsel %vm474_vm0, %v2027_v37, -inf }
  0x41   : > { %v964_v17 = vsel %vm474_vm0, %v902_v10, -inf  ;;  %v928_v18 = vmax.f32 %v926_v6, %v927_v13  ;;  %v958_v19 = vrot.slane %v957_v16, 4  ;;  %v2081_v23 = vmul.f32 0.5, %v2014_v30  ;;  %v379_v59 = vld [vmem:[#allocation2 + $0x4] sm:$0xf] }
  0x42   : > { %1774 = vpow2.f32 %v627_v11  ;;  %v965_v20 = vrot.slane %v964_v17, 4  ;;  %v520_v21 = vrot.slane %v519_v15, 2  ;;  %v526_v22 = vmax.f32 %v524_v9, %v525_v35  ;;  %v2101_v9 = vld [vmem:[%s2010_s5 + $0x28] sm:$0xff] }
  0x43   : > { %v459_v24 = vcombine.high %v2075_v14, %v2075_v14  ;;  %v1043_v25 = vcombine.low %v921_v12, %v928_v18  ;;  %v959_v26 = vmax.f32 %v957_v16, %v958_v19  ;;  %v489_v28 = vsel %vm474_vm0, %v2075_v14, -inf }
  0x44   : > { %v966_v27 = vmax.f32 %v964_v17, %v965_v20  ;;  %v521_v31 = vmax.f32 %v519_v15, %v520_v21  ;;  %v527_v33 = vrot.slane %v526_v22, 2  ;;  %v371_v40 = vsub.f32 %v2075_v14, %v2081_v23 }
  0x45   : > { %v490_v41 = vrot.slane %v489_v28, 4  ;;  %v1059_v42 = vsub.f32 %v2025_v36, %v1043_v25  ;;  %v960_v43 = vrot.slane %v959_v26, 2  ;;  %v496_v44 = vsel %vm474_vm0, %v459_v24, -inf }
  0x46   : > { %v967_v30 = vrot.slane %v966_v27, 2  ;;  %v522_v45 = vrot.slane %v521_v31, 1  ;;  %v528_v46 = vmax.f32 %v526_v22, %v527_v33  ;;  %v387_v47 = vmul.f32 %v371_v40, %v371_v40 }
  0x47   : > { %v491_v48 = vmax.f32 %v489_v28, %v490_v41  ;;  %v1067_v49 = vmul.f32 1.442695, %v1059_v42  ;;  %v961_v50 = vmax.f32 %v959_v26, %v960_v43  ;;  %v1329_v52 = vld [vmem:[#allocation2 + $0xc] sm:$0xf]  ;;  %v497_v53 = vrot.slane %v496_v44, 4 }
  0x48   : > { %v968_v51 = vmax.f32 %v966_v27, %v967_v30  ;;  %v523_v54 = vmax.f32 %v521_v31, %v522_v45  ;;  %v529_v55 = vrot.slane %v528_v46, 1  ;;  %v1343_v56 = vsel %vm474_vm0, %v1329_v52, 0.0 }
  0x49   : > { %v403_v57 = vrot.slane %v387_v47, 4  ;;  %1776 = vpow2.f32 %v1067_v49  ;;  %v962_v36 = vrot.slane %v961_v50, 1  ;;  %1344 = vadd.xlane.f32.xlu1 %v1343_v56  ;;  %v492_v60 = vrot.slane %v491_v48, 2 }
  0x4a   : > { %v969_v58 = vrot.slane %v968_v51, 1  ;;  %v530_v61 = vmax.f32 %v528_v46, %v529_v55  ;;  %v498_v63 = vmax.f32 %v496_v44, %v497_v53  ;;  %v900_v0 = vcombine.high %v2081_v23, %v2081_v23  ;;  %v383_v46 = vld [vmem:[#allocation2 + $0x14] sm:$0xf] }
  0x4b   : > { %v419_v62 = vadd.f32 %v403_v57, %v387_v47  ;;  %v2094_v1 = vpop.eup %1770  ;;  %v963_v2 = vmax.f32 %v961_v50, %v962_v36  ;;  %v493_v34 = vmax.f32 %v491_v48, %v492_v60  ;;  %v929_v4 = vsel %vm474_vm0, %v2081_v23, -inf }
  0x4c   : > { %v970_v3 = vmax.f32 %v968_v51, %v969_v58  ;;  %v2098_v29 = vpop.eup %1772  ;;  %v606_v5 = vcombine.low %v523_v54, %v530_v61  ;;  %v499_v7 = vrot.slane %v498_v63, 2  ;;  %v930_v8 = vrot.slane %v929_v4, 4  ;;  %v2127_v61 = vld [vmem:[%s2010_s5 + $0x20] sm:$0xff] }
  0x4d   : > { %v427_v6 = vadd.f32 %v419_v62, %v379_v59  ;;  %v494_v11 = vrot.slane %v493_v34, 1  ;;  %v936_v12 = vsel %vm474_vm0, %v900_v0, -inf  ;;  %v2105_v13 = vmul.f32 0.5, %v2029_v38 }
  0x4e   : > { %v1046_v10 = vcombine.low %v963_v2, %v970_v3  ;;  %v622_v35 = vsub.f32 %v2057_v32, %v606_v5  ;;  %v500_v16 = vmax.f32 %v498_v63, %v499_v7  ;;  %v931_v17 = vmax.f32 %v929_v4, %v930_v8 }
  0x4f   : > { %v2107_v15 = vpop.eup %1774  ;;  %435 = vst [vmem:[#allocation2 + $0x4] sm:$0xf] %v427_v6  ;;  %v937_v18 = vrot.slane %v936_v12, 4  ;;  %v495_v20 = vmax.f32 %v493_v34, %v494_v11  ;;  %v375_v21 = vsub.f32 %v2101_v9, %v2105_v13  ;;  %v463_v22 = vcombine.high %v2101_v9, %v2101_v9 }
  0x50   : > { %v1062_v19 = vsub.f32 %v2027_v37, %v1046_v10  ;;  %v633_v24 = vmul.f32 1.442695, %v622_v35  ;;  %v501_v38 = vrot.slane %v500_v16, 1  ;;  %v932_v25 = vrot.slane %v931_v17, 2 }
  0x51   : > { %v938_v26 = vmax.f32 %v936_v12, %v937_v18  ;;  %v391_v28 = vmul.f32 %v375_v21, %v375_v21  ;;  %v545_v32 = vsel %vm474_vm0, %v2101_v9, -inf  ;;  %v552_v31 = vsel %vm474_vm0, %v463_v22, -inf }
  0x52   : > { %v1073_v27 = vmul.f32 1.442695, %v1062_v19  ;;  %1778 = vpow2.f32 %v633_v24  ;;  %v502_v37 = vmax.f32 %v500_v16, %v501_v38  ;;  %v933_v33 = vmax.f32 %v931_v17, %v932_v25 }
  0x53   : > { %v939_v40 = vrot.slane %v938_v26, 2  ;;  %v407_v41 = vrot.slane %v391_v28, 4  ;;  %v546_v42 = vrot.slane %v545_v32, 4  ;;  %v553_v43 = vrot.slane %v552_v31, 4 }
  0x54   : > { %1780 = vpow2.f32 %v1073_v27  ;;  %v604_v30 = vcombine.low %v495_v20, %v502_v37  ;;  %v934_v44 = vrot.slane %v933_v33, 1  ;;  %v904_v47 = vcombine.high %v2105_v13, %v2105_v13 }
  0x55   : > { %v940_v45 = vmax.f32 %v938_v26, %v939_v40  ;;  %v423_v49 = vadd.f32 %v407_v41, %v391_v28  ;;  %v547_v50 = vmax.f32 %v545_v32, %v546_v42  ;;  %v554_v51 = vmax.f32 %v552_v31, %v553_v43  ;;  %v382_v32 = vld [vmem:[#allocation2 + $0x10] sm:$0xf] }
  0x56   : > { %v1327_v48 = vld [vmem:[#allocation2 + $0x4] sm:$0xf]  ;;  %v985_v52 = vsel %vm474_vm0, %v2105_v13, -inf  ;;  %v2122_v53 = vpop.eup %1776  ;;  %v620_v54 = vsub.f32 %v2075_v14, %v604_v30  ;;  %v935_v55 = vmax.f32 %v933_v33, %v934_v44  ;;  %v992_v0 = vsel %vm474_vm0, %v904_v47, -inf  ;;  %v1715_v47 = vld [vmem:[%s1995_s29 + $0x78] sm:$0xff] }
  0x57   : > { %v941_v56 = vrot.slane %v940_v45, 1  ;;  %v1337_v57 = vsel %vm474_vm0, %v1327_v48, 0.0  ;;  %v431_v36 = vadd.f32 %v423_v49, %v383_v46  ;;  %v548_v58 = vrot.slane %v547_v50, 2  ;;  %v344_v46 = vld [vmem:[%s1995_s29 + $0x38] sm:$0xff] }
  0x58   : > { %1338 = vadd.xlane.f32.xlu0 %v1337_v57  ;;  %v555_v59 = vrot.slane %v554_v51, 2  ;;  %v986_v60 = vrot.slane %v985_v52, 4  ;;  %v629_v62 = vmul.f32 1.442695, %v620_v54  ;;  %v2131_v2 = vmul.f32 0.5, %v2031_v39 }
  0x59   : > { %v942_v63 = vmax.f32 %v940_v45, %v941_v56  ;;  %439 = vst [vmem:[#allocation2 + $0x14] sm:$0xf] %v431_v36  ;;  %v549_v14 = vmax.f32 %v547_v50, %v548_v58  ;;  %v993_v4 = vrot.slane %v992_v0, 4  ;;  %v462_v7 = vcombine.high %v2127_v61, %v2127_v61 }
  0x5a   : > { %v556_v3 = vmax.f32 %v554_v51, %v555_v59  ;;  %v987_v34 = vmax.f32 %v985_v52, %v986_v60  ;;  %1782 = vpow2.f32 %v629_v62  ;;  %v374_v6 = vsub.f32 %v2127_v61, %v2131_v2  ;;  %v2154_v52 = vld [vmem:[%s2010_s5 + $0x38] sm:$0xff] }
  0x5b   : > { %v1044_v5 = vcombine.low %v935_v55, %v942_v63  ;;  %v550_v8 = vrot.slane %v549_v14, 1  ;;  %v994_v12 = vmax.f32 %v992_v0, %v993_v4  ;;  %v531_v16 = vsel %vm474_vm0, %v2127_v61, -inf }
  0x5c   : > { %v557_v10 = vrot.slane %v556_v3, 1  ;;  %v988_v11 = vrot.slane %v987_v34, 2  ;;  %v390_v35 = vmul.f32 %v374_v6, %v374_v6  ;;  %v538_v17 = vsel %vm474_vm0, %v462_v7, -inf }
  0x5d   : > { %v1060_v39 = vsub.f32 %v2081_v23, %v1044_v5  ;;  %v551_v18 = vmax.f32 %v549_v14, %v550_v8  ;;  %v995_v21 = vrot.slane %v994_v12, 2  ;;  %v532_v38 = vrot.slane %v531_v16, 4 }
  0x5e   : > { %v558_v19 = vmax.f32 %v556_v3, %v557_v10  ;;  %v989_v20 = vmax.f32 %v987_v34, %v988_v11  ;;  %v406_v24 = vrot.slane %v390_v35, 4  ;;  %v539_v25 = vrot.slane %v538_v17, 4 }
  0x5f   : > { %v1069_v22 = vmul.f32 1.442695, %v1060_v39  ;;  %v2141_v26 = vpop.eup %1778  ;;  %v996_v28 = vmax.f32 %v994_v12, %v995_v21  ;;  %v903_v31 = vcombine.high %v2131_v2, %v2131_v2  ;;  %v533_v41 = vmax.f32 %v531_v16, %v532_v38 }
  0x60   : > { %v608_v27 = vcombine.low %v551_v18, %v558_v19  ;;  %v990_v23 = vrot.slane %v989_v20, 1  ;;  %v1331_v33 = vld [vmem:[#allocation2 + $0x14] sm:$0xf]  ;;  %v422_v40 = vadd.f32 %v406_v24, %v390_v35  ;;  %v540_v42 = vmax.f32 %v538_v17, %v539_v25 }
  0x61   : > { %v2145_v37 = vpop.eup %1780  ;;  %1784 = vpow2.f32 %v1069_v22  ;;  %v997_v44 = vrot.slane %v996_v28, 1  ;;  %v1349_v45 = vsel %vm474_vm0, %v1331_v33, 0.0  ;;  %v534_v49 = vrot.slane %v533_v41, 2  ;;  %v1714_v33 = vld [vmem:[%s1995_s29 + $0x70] sm:$0xff] }
  0x62   : > { %v624_v43 = vsub.f32 %v2101_v9, %v608_v27  ;;  %v991_v30 = vmax.f32 %v989_v20, %v990_v23  ;;  %1350 = vadd.xlane.f32.xlu1 %v1349_v45  ;;  %v430_v48 = vadd.f32 %v422_v40, %v382_v32  ;;  %v541_v50 = vrot.slane %v540_v42, 2 }
  0x63   : > { %v971_v51 = vsel %vm474_vm0, %v2131_v2, -inf  ;;  %v998_v55 = vmax.f32 %v996_v28, %v997_v44  ;;  %v978_v9 = vsel %vm474_vm0, %v903_v31, -inf  ;;  %v535_v57 = vmax.f32 %v533_v41, %v534_v49  ;;  %v343_v31 = vld [vmem:[%s1995_s29 + $0x30] sm:$0xff] }
  0x64   : > { %v637_v54 = vmul.f32 1.442695, %v624_v43  ;;  %v972_v56 = vrot.slane %v971_v51, 4  ;;  %438 = vst [vmem:[#allocation2 + $0x10] sm:$0xf] %v430_v48  ;;  %v542_v36 = vmax.f32 %v540_v42, %v541_v50  ;;  %v979_v58 = vrot.slane %v978_v9, 4 }
  0x65   : > { %v361_v59 = vadd.f32 %v1715_v47, %v344_v46  ;;  %v1048_v60 = vcombine.low %v991_v30, %v998_v55  ;;  %v465_v63 = vcombine.high %v2154_v52, %v2154_v52  ;;  %v536_v0 = vrot.slane %v535_v57, 1  ;;  %v385_v42 = vld [vmem:[#allocation2 + $0x1c] sm:$0xf] }
  0x66   : > { %1786 = vpow2.f32 %v637_v54  ;;  %v973_v62 = vmax.f32 %v971_v51, %v972_v56  ;;  %v543_v14 = vrot.slane %v542_v36, 1  ;;  %v980_v3 = vmax.f32 %v978_v9, %v979_v58  ;;  %v2181_v51 = vld [vmem:[%s2010_s5 + $0x30] sm:$0xff] }
  0x67   : > { %v2159_v34 = vmul.f32 0.5, %v361_v59  ;;  %v2161_v4 = vpop.eup %1782  ;;  %v1064_v5 = vsub.f32 %v2105_v13, %v1048_v60  ;;  %v573_v7 = vsel %vm474_vm0, %v2154_v52, -inf  ;;  %v580_v8 = vsel %vm474_vm0, %v465_v63, -inf }
  0x68   : > { %v974_v6 = vrot.slane %v973_v62, 2  ;;  %v537_v10 = vmax.f32 %v535_v57, %v536_v0  ;;  %v544_v11 = vmax.f32 %v542_v36, %v543_v14  ;;  %v981_v12 = vrot.slane %v980_v3, 2 }
  0x69   : > { %v377_v39 = vsub.f32 %v2154_v52, %v2159_v34  ;;  %v1077_v35 = vmul.f32 1.442695, %v1064_v5  ;;  %v574_v17 = vrot.slane %v573_v7, 4  ;;  %v581_v18 = vrot.slane %v580_v8, 4 }
  0x6a   : > { %v975_v16 = vmax.f32 %v973_v62, %v974_v6  ;;  %v607_v19 = vcombine.low %v537_v10, %v544_v11  ;;  %v982_v13 = vmax.f32 %v980_v3, %v981_v12  ;;  %v906_v21 = vcombine.high %v2159_v34, %v2159_v34 }
  0x6b   : > { %v393_v20 = vmul.f32 %v377_v39, %v377_v39  ;;  %1788 = vpow2.f32 %v1077_v35  ;;  %v1330_v24 = vld [vmem:[#allocation2 + $0x10] sm:$0xf]  ;;  %v575_v38 = vmax.f32 %v573_v7, %v574_v17  ;;  %v582_v25 = vmax.f32 %v580_v8, %v581_v18 }
  0x6c   : > { %v976_v22 = vrot.slane %v975_v16, 1  ;;  %v623_v27 = vsub.f32 %v2127_v61, %v607_v19  ;;  %v983_v23 = vrot.slane %v982_v13, 1  ;;  %v1346_v28 = vsel %vm474_vm0, %v1330_v24, 0.0 }
  0x6d   : > { %v409_v32 = vrot.slane %v393_v20, 4  ;;  %1347 = vadd.xlane.f32.xlu0 %v1346_v28  ;;  %v576_v43 = vrot.slane %v575_v38, 2  ;;  %v583_v30 = vrot.slane %v582_v25, 2  ;;  %v1013_v44 = vsel %vm474_vm0, %v2159_v34, -inf }
  0x6e   : > { %v2175_v40 = vpop.eup %1784  ;;  %v977_v41 = vmax.f32 %v975_v16, %v976_v22  ;;  %v635_v45 = vmul.f32 1.442695, %v623_v27  ;;  %v984_v46 = vmax.f32 %v982_v13, %v983_v23  ;;  %v1014_v47 = vrot.slane %v1013_v44, 4 }
  0x6f   : > { %v425_v61 = vadd.f32 %v409_v32, %v393_v20  ;;  %v577_v48 = vmax.f32 %v575_v38, %v576_v43  ;;  %v584_v49 = vmax.f32 %v582_v25, %v583_v30  ;;  %v1020_v50 = vsel %vm474_vm0, %v906_v21, -inf  ;;  %v384_v25 = vld [vmem:[#allocation2 + $0x18] sm:$0xf] }
  0x70   : > { %v360_v54 = vadd.f32 %v1714_v33, %v343_v31  ;;  %1790 = vpow2.f32 %v635_v45  ;;  %v1047_v55 = vcombine.low %v977_v41, %v984_v46  ;;  %v1015_v9 = vmax.f32 %v1013_v44, %v1014_v47 }
  0x71   : > { %v433_v56 = vadd.f32 %v425_v61, %v385_v42  ;;  %v578_v57 = vrot.slane %v577_v48, 1  ;;  %v585_v36 = vrot.slane %v584_v49, 1  ;;  %v1021_v58 = vrot.slane %v1020_v50, 4 }
  0x72   : > { %v2183_v59 = vmul.f32 0.5, %v360_v54  ;;  %v1063_v62 = vsub.f32 %v2131_v2, %v1047_v55  ;;  %v1016_v63 = vrot.slane %v1015_v9, 2  ;;  %v464_v0 = vcombine.high %v2181_v51, %v2181_v51 }
  0x73   : > { %v2185_v60 = vpop.eup %1786  ;;  %441 = vst [vmem:[#allocation2 + $0x1c] sm:$0xf] %v433_v56  ;;  %v559_v14 = vsel %vm474_vm0, %v2181_v51, -inf  ;;  %v579_v3 = vmax.f32 %v577_v48, %v578_v57  ;;  %v586_v5 = vmax.f32 %v584_v49, %v585_v36  ;;  %v1022_v6 = vmax.f32 %v1020_v50, %v1021_v58 }
  0x74   : > { %v376_v7 = vsub.f32 %v2181_v51, %v2183_v59  ;;  %v1075_v8 = vmul.f32 1.442695, %v1063_v62  ;;  %v1017_v10 = vmax.f32 %v1015_v9, %v1016_v63  ;;  %v560_v11 = vrot.slane %v559_v14, 4 }
  0x75   : > { %v566_v12 = vsel %vm474_vm0, %v464_v0, -inf  ;;  %v610_v2 = vcombine.low %v579_v3, %v586_v5  ;;  %v1023_v39 = vrot.slane %v1022_v6, 2  ;;  %v905_v19 = vcombine.high %v2183_v59, %v2183_v59 }
  0x76   : > { %v392_v35 = vmul.f32 %v376_v7, %v376_v7  ;;  %v567_v16 = vrot.slane %v566_v12, 4  ;;  %1792 = vpow2.f32 %v1075_v8  ;;  %v1018_v17 = vrot.slane %v1017_v10, 1 }
  0x77   : > { %v561_v18 = vmax.f32 %v559_v14, %v560_v11  ;;  %v626_v13 = vsub.f32 %v2154_v52, %v610_v2  ;;  %v1024_v20 = vmax.f32 %v1022_v6, %v1023_v39  ;;  %v999_v23 = vsel %vm474_vm0, %v2183_v59, -inf }
  0x78   : > { %v408_v21 = vrot.slane %v392_v35, 4  ;;  %v568_v22 = vmax.f32 %v566_v12, %v567_v16  ;;  %v2198_v24 = vpop.eup %1788  ;;  %v1019_v38 = vmax.f32 %v1017_v10, %v1018_v17  ;;  %v1006_v28 = vsel %vm474_vm0, %v905_v19, -inf }
  0x79   : > { %v562_v27 = vrot.slane %v561_v18, 2  ;;  %v641_v32 = vmul.f32 1.442695, %v626_v13  ;;  %v1025_v31 = vrot.slane %v1024_v20, 1  ;;  %v1000_v30 = vrot.slane %v999_v23, 4 }
  0x7a   : > { %v1333_v33 = vld [vmem:[#allocation2 + $0x1c] sm:$0xf]  ;;  %v424_v41 = vadd.f32 %v408_v21, %v392_v35  ;;  %v569_v42 = vrot.slane %v568_v22, 2  ;;  %v1007_v44 = vrot.slane %v1006_v28, 4  ;;  %v652_v50 = vcombine.high %v2161_v4, %v2161_v4 }
  0x7b   : > { %v1355_v52 = vsel %vm474_vm0, %v1333_v33, 0.0  ;;  %v563_v43 = vmax.f32 %v561_v18, %v562_v27  ;;  %1794 = vpow2.f32 %v641_v32  ;;  %v1026_v45 = vmax.f32 %v1024_v20, %v1025_v31 }
  0x7c   : > { %1356 = vadd.xlane.f32.xlu1 %v1355_v52  ;;  %v432_v46 = vadd.f32 %v424_v41, %v384_v25  ;;  %v570_v61 = vmax.f32 %v568_v22, %v569_v42  ;;  %v1001_v48 = vmax.f32 %v999_v23, %v1000_v30  ;;  %v1008_v49 = vmax.f32 %v1006_v28, %v1007_v44 }
  0x7d   : > { %v564_v47 = vrot.slane %v563_v43, 1  ;;  %v2206_v54 = vpop.eup %1790  ;;  %v1050_v55 = vcombine.low %v1019_v38, %v1026_v45  ;;  %v681_v9 = vsel %vm474_vm0, %v2161_v4, 0.0  ;;  %v651_v57 = vcombine.high %v2107_v15, %v2107_v15 }
  0x7e   : > { %440 = vst [vmem:[#allocation2 + $0x18] sm:$0xf] %v432_v46  ;;  %v571_v56 = vrot.slane %v570_v61, 1  ;;  %v1002_v58 = vrot.slane %v1001_v48, 2  ;;  %v1009_v62 = vrot.slane %v1008_v49, 2  ;;  %v682_v63 = vrot.slane %v681_v9, 4 }
  0x7f   : > { %v565_v36 = vmax.f32 %v563_v43, %v564_v47  ;;  %v1066_v0 = vsub.f32 %v2159_v34, %v1050_v55  ;;  %v688_v3 = vsel %vm474_vm0, %v652_v50, 0.0  ;;  %v667_v5 = vsel %vm474_vm0, %v2107_v15, 0.0 }
  0x80   : > { %v572_v14 = vmax.f32 %v570_v61, %v571_v56  ;;  %v1003_v6 = vmax.f32 %v1001_v48, %v1002_v58  ;;  %v1010_v7 = vmax.f32 %v1008_v49, %v1009_v62  ;;  %v683_v8 = vadd.f32 %v682_v63, %v681_v9 }
  0x81   : > { %v689_v10 = vrot.slane %v688_v3, 4  ;;  %v1081_v11 = vmul.f32 1.442695, %v1066_v0  ;;  %v668_v2 = vrot.slane %v667_v5, 4  ;;  %v674_v39 = vsel %vm474_vm0, %v651_v57, 0.0 }
  0x82   : > { %v609_v12 = vcombine.low %v565_v36, %v572_v14  ;;  %v1004_v35 = vrot.slane %v1003_v6, 1  ;;  %v1011_v16 = vrot.slane %v1010_v7, 1  ;;  %v684_v17 = vrot.slane %v683_v8, 2 }
  0x83   : > { %v690_v18 = vadd.f32 %v689_v10, %v688_v3  ;;  %v2217_v34 = vpop.eup %1792  ;;  %1796 = vpow2.f32 %v1081_v11  ;;  %v669_v13 = vadd.f32 %v668_v2, %v667_v5  ;;  %v675_v20 = vrot.slane %v674_v39, 4 }
  0x84   : > { %v625_v19 = vsub.f32 %v2181_v51, %v609_v12  ;;  %v1005_v21 = vmax.f32 %v1003_v6, %v1004_v35  ;;  %v1012_v22 = vmax.f32 %v1010_v7, %v1011_v16  ;;  %v685_v25 = vadd.f32 %v684_v17, %v683_v8 }
  0x85   : > { %v1332_v38 = vld [vmem:[#allocation2 + $0x18] sm:$0xf]  ;;  %v691_v27 = vrot.slane %v690_v18, 2  ;;  %v670_v32 = vrot.slane %v669_v13, 2  ;;  %v676_v31 = vadd.f32 %v675_v20, %v674_v39  ;;  %v654_v52 = vcombine.high %v2141_v26, %v2141_v26 }
  0x86   : > { %v639_v23 = vmul.f32 1.442695, %v625_v19  ;;  %v1352_v28 = vsel %vm474_vm0, %v1332_v38, 0.0  ;;  %v1049_v33 = vcombine.low %v1005_v21, %v1012_v22  ;;  %v686_v41 = vrot.slane %v685_v25, 1 }
  0x87   : > { %1353 = vadd.xlane.f32.xlu0 %v1352_v28  ;;  %v692_v42 = vadd.f32 %v691_v27, %v690_v18  ;;  %v671_v51 = vadd.f32 %v670_v32, %v669_v13  ;;  %v677_v43 = vrot.slane %v676_v31, 2  ;;  %v709_v30 = vsel %vm474_vm0, %v2141_v26, 0.0 }
  0x88   : > { %1798 = vpow2.f32 %v639_v23  ;;  %v2225_v44 = vpop.eup %1794  ;;  %v1065_v45 = vsub.f32 %v2183_v59, %v1049_v33  ;;  %v687_v46 = vadd.f32 %v686_v41, %v685_v25  ;;  %v710_v47 = vrot.slane %v709_v30, 4 }
  0x89   : > { %v693_v61 = vrot.slane %v692_v42, 1  ;;  %v672_v48 = vrot.slane %v671_v51, 1  ;;  %v678_v49 = vadd.f32 %v677_v43, %v676_v31  ;;  %v716_v50 = vsel %vm474_vm0, %v654_v52, 0.0 }
  0x8a   : > { %v653_v55 = vcombine.high %v2094_v1, %v2094_v1  ;;  %v1079_v56 = vmul.f32 1.442695, %v1065_v45  ;;  %1800 = vrcp.f32 %v687_v46  ;;  %v711_v57 = vadd.f32 %v710_v47, %v709_v30 }
  0x8b   : > { %v694_v9 = vadd.f32 %v693_v61, %v692_v42  ;;  %v673_v36 = vadd.f32 %v672_v48, %v671_v51  ;;  %v679_v58 = vrot.slane %v678_v49, 1  ;;  %v717_v62 = vrot.slane %v716_v50, 4 }
  0x8c   : > { %v695_v59 = vsel %vm474_vm0, %v2094_v1, 0.0  ;;  %1802 = vpow2.f32 %v1079_v56  ;;  %v712_v63 = vrot.slane %v711_v57, 2  ;;  %v702_v14 = vsel %vm474_vm0, %v653_v55, 0.0 }
  0x8d   : > { %v696_v0 = vrot.slane %v695_v59, 4  ;;  %1804 = vrcp.f32 %v694_v9  ;;  %v680_v3 = vadd.f32 %v679_v58, %v678_v49  ;;  %v718_v5 = vadd.f32 %v717_v62, %v716_v50 }
  0x8e   : > { %v703_v6 = vrot.slane %v702_v14, 4  ;;  %1806 = vrcp.f32 %v673_v36  ;;  %v713_v7 = vadd.f32 %v712_v63, %v711_v57  ;;  %v656_v10 = vcombine.high %v2185_v60, %v2185_v60 }
  0x8f   : > { %v697_v8 = vadd.f32 %v696_v0, %v695_v59  ;;  %1808 = vrcp.f32 %v680_v3  ;;  %v719_v11 = vrot.slane %v718_v5, 2  ;;  %v737_v2 = vsel %vm474_vm0, %v2185_v60, 0.0 }
  0x90   : > { %v704_v12 = vadd.f32 %v703_v6, %v702_v14  ;;  %v2238_v39 = vpop.eup %1796  ;;  %v714_v35 = vrot.slane %v713_v7, 1  ;;  %v738_v17 = vrot.slane %v737_v2, 4  ;;  %v744_v18 = vsel %vm474_vm0, %v656_v10, 0.0 }
  0x91   : > { %v698_v16 = vrot.slane %v697_v8, 2  ;;  %v720_v19 = vadd.f32 %v719_v11, %v718_v5  ;;  %v745_v20 = vrot.slane %v744_v18, 4  ;;  %v655_v21 = vcombine.high %v2206_v54, %v2206_v54 }
  0x92   : > { %v705_v13 = vrot.slane %v704_v12, 2  ;;  %v715_v22 = vadd.f32 %v714_v35, %v713_v7  ;;  %v739_v25 = vadd.f32 %v738_v17, %v737_v2  ;;  %v723_v27 = vsel %vm474_vm0, %v2206_v54, 0.0 }
  0x93   : > { %v699_v38 = vadd.f32 %v698_v16, %v697_v8  ;;  %v721_v23 = vrot.slane %v720_v19, 1  ;;  %v746_v32 = vadd.f32 %v745_v20, %v744_v18  ;;  %v724_v31 = vrot.slane %v723_v27, 4 }
  0x94   : > { %v706_v28 = vadd.f32 %v705_v13, %v704_v12  ;;  %1810 = vrcp.f32 %v715_v22  ;;  %v740_v42 = vrot.slane %v739_v25, 2  ;;  %v730_v52 = vsel %vm474_vm0, %v655_v21, 0.0 }
  0x95   : > { %v2245_v33 = vpop.eup %1798  ;;  %v700_v41 = vrot.slane %v699_v38, 1  ;;  %v722_v51 = vadd.f32 %v721_v23, %v720_v19  ;;  %v747_v30 = vrot.slane %v746_v32, 2  ;;  %v725_v45 = vadd.f32 %v724_v31, %v723_v27 }
  0x96   : > { %v707_v43 = vrot.slane %v706_v28, 1  ;;  %v741_v61 = vadd.f32 %v740_v42, %v739_v25  ;;  %v731_v47 = vrot.slane %v730_v52, 4  ;;  %v658_v48 = vcombine.high %v2225_v44, %v2225_v44 }
  0x97   : > { %v701_v46 = vadd.f32 %v700_v41, %v699_v38  ;;  %v1801_v49 = vpop.eup %1800  ;;  %1812 = vrcp.f32 %v722_v51  ;;  %v748_v55 = vadd.f32 %v747_v30, %v746_v32  ;;  %v726_v56 = vrot.slane %v725_v45, 2 }
  0x98   : > { %v708_v50 = vadd.f32 %v707_v43, %v706_v28  ;;  %v742_v9 = vrot.slane %v741_v61, 1  ;;  %v732_v57 = vadd.f32 %v731_v47, %v730_v52  ;;  %v765_v36 = vsel %vm474_vm0, %v2225_v44, 0.0  ;;  %v443_v28 = vld [vmem:[#allocation3 + $0x4] sm:$0xf] }
  0x99   : > { %1814 = vrcp.f32 %v701_v46  ;;  %v2252_v58 = vpop.eup %1802  ;;  %v749_v62 = vrot.slane %v748_v55, 1  ;;  %v727_v59 = vadd.f32 %v726_v56, %v725_v45  ;;  %v766_v63 = vrot.slane %v765_v36, 4  ;;  %v442_v45 = vld [vmem:[#allocation3] sm:$0xf] }
  0x9a   : > { %1816 = vrcp.f32 %v708_v50  ;;  %v1805_v0 = vpop.eup %1804  ;;  %v743_v14 = vadd.f32 %v742_v9, %v741_v61  ;;  %v733_v3 = vrot.slane %v732_v57, 2  ;;  %v772_v5 = vsel %vm474_vm0, %v658_v48, 0.0 }
  0x9b   : > { %v657_v6 = vcombine.high %v2245_v33, %v2245_v33  ;;  %v1807_v7 = vpop.eup %1806  ;;  %v812_v8 = vcombine.low %v1801_v49, %v1805_v0  ;;  %v750_v10 = vadd.f32 %v749_v62, %v748_v55  ;;  %v728_v11 = vrot.slane %v727_v59, 1 }
  0x9c   : > { %v767_v12 = vadd.f32 %v766_v63, %v765_v36  ;;  %v1809_v2 = vpop.eup %1808  ;;  %1818 = vrcp.f32 %v743_v14  ;;  %v734_v35 = vadd.f32 %v733_v3, %v732_v57  ;;  %v773_v16 = vrot.slane %v772_v5, 4 }
  0x9d   : > { %v751_v17 = vsel %vm474_vm0, %v2245_v33, 0.0  ;;  %v828_v18 = vmul.f32 %v2161_v4, %v812_v8  ;;  %v811_v19 = vcombine.low %v1807_v7, %v1809_v2  ;;  %1820 = vrcp.f32 %v750_v10 }
  0x9e   : > { %v729_v13 = vadd.f32 %v728_v11, %v727_v59  ;;  %v735_v20 = vrot.slane %v734_v35, 1  ;;  %v768_v21 = vrot.slane %v767_v12, 2  ;;  %v774_v22 = vadd.f32 %v773_v16, %v772_v5 }
  0x9f   : > { %v752_v38 = vrot.slane %v751_v17, 4  ;;  %v844_v25 = vrot.slane %v828_v18, 4  ;;  %v827_v27 = vmul.f32 %v2107_v15, %v811_v19  ;;  %v758_v23 = vsel %vm474_vm0, %v657_v6, 0.0 }
  0xa0   : > { %1822 = vrcp.f32 %v729_v13  ;;  %v736_v32 = vadd.f32 %v735_v20, %v734_v35  ;;  %v769_v31 = vadd.f32 %v768_v21, %v767_v12  ;;  %v775_v41 = vrot.slane %v774_v22, 2 }
  0xa1   : > { %v753_v42 = vadd.f32 %v752_v38, %v751_v17  ;;  %v1811_v52 = vpop.eup %1810  ;;  %v860_v4 = vmax.f32 %v828_v18, %v844_v25  ;;  %v843_v51 = vrot.slane %v827_v27, 4  ;;  %v759_v43 = vrot.slane %v758_v23, 4 }
  0xa2   : > { %v1092_v30 = vcombine.high %v2175_v40, %v2175_v40  ;;  %1824 = vrcp.f32 %v736_v32  ;;  %v770_v46 = vrot.slane %v769_v31, 1  ;;  %v776_v61 = vadd.f32 %v775_v41, %v774_v22  ;;  %v445_v22 = vld [vmem:[#allocation3 + $0xc] sm:$0xf] }
  0xa3   : > { %v754_v15 = vrot.slane %v753_v42, 2  ;;  %v868_v47 = vmax.f32 %v443_v28, %v860_v4  ;;  %v859_v48 = vmax.f32 %v827_v27, %v843_v51  ;;  %v760_v49 = vadd.f32 %v759_v43, %v758_v23  ;;  %v444_v23 = vld [vmem:[#allocation3 + $0x8] sm:$0xf] }
  0xa4   : > { %v1121_v50 = vsel %vm474_vm0, %v2175_v40, 0.0  ;;  %v1813_v55 = vpop.eup %1812  ;;  %v771_v56 = vadd.f32 %v770_v46, %v769_v31  ;;  %v777_v9 = vrot.slane %v776_v61, 1  ;;  %v1128_v14 = vsel %vm474_vm0, %v1092_v30, 0.0 }
  0xa5   : > { %v755_v57 = vadd.f32 %v754_v15, %v753_v42  ;;  %v1122_v36 = vrot.slane %v1121_v50, 4  ;;  %876 = vst [vmem:[#allocation3 + $0x4] sm:$0xf] %v868_v47  ;;  %v867_v59 = vmax.f32 %v442_v45, %v859_v48  ;;  %v814_v63 = vcombine.low %v1811_v52, %v1813_v55 }
  0xa6   : > { %v1815_v62 = vpop.eup %1814  ;;  %v761_v0 = vrot.slane %v760_v49, 2  ;;  %v778_v5 = vadd.f32 %v777_v9, %v776_v61  ;;  %1826 = vrcp.f32 %v771_v56  ;;  %v1129_v12 = vrot.slane %v1128_v14, 4 }
  0xa7   : > { %v1817_v3 = vpop.eup %1816  ;;  %v756_v6 = vrot.slane %v755_v57, 1  ;;  %v1123_v7 = vadd.f32 %v1122_v36, %v1121_v50  ;;  %875 = vst [vmem:[#allocation3] sm:$0xf] %v867_v59  ;;  %v830_v8 = vmul.f32 %v2141_v26, %v814_v63  ;;  %v1091_v16 = vcombine.high %v2122_v53, %v2122_v53 }
  0xa8   : > { %v813_v10 = vcombine.low %v1815_v62, %v1817_v3  ;;  %v762_v11 = vadd.f32 %v761_v0, %v760_v49  ;;  %1828 = vrcp.f32 %v778_v5  ;;  %v1130_v20 = vadd.f32 %v1129_v12, %v1128_v14 }
  0xa9   : > { %v757_v2 = vadd.f32 %v756_v6, %v755_v57  ;;  %v1124_v35 = vrot.slane %v1123_v7, 2  ;;  %v1819_v17 = vpop.eup %1818  ;;  %v846_v18 = vrot.slane %v830_v8, 4  ;;  %v1107_v26 = vsel %vm474_vm0, %v2122_v53, 0.0  ;;  %v447_v57 = vld [vmem:[#allocation3 + $0x14] sm:$0xf] }
  0xaa   : > { %v829_v19 = vmul.f32 %v2094_v1, %v813_v10  ;;  %v763_v13 = vrot.slane %v762_v11, 1  ;;  %v1821_v21 = vpop.eup %1820  ;;  %v1114_v25 = vsel %vm474_vm0, %v1091_v16, 0.0  ;;  %v1131_v1 = vrot.slane %v1130_v20, 2 }
  0xab   : > { %1830 = vrcp.f32 %v757_v2  ;;  %v1125_v38 = vadd.f32 %v1124_v35, %v1123_v7  ;;  %v862_v27 = vmax.f32 %v830_v8, %v846_v18  ;;  %v816_v32 = vcombine.low %v1819_v17, %v1821_v21 }
  0xac   : > { %v845_v28 = vrot.slane %v829_v19, 4  ;;  %v764_v31 = vadd.f32 %v763_v13, %v762_v11  ;;  %v1426_v42 = vld [vmem:[#allocation3 + $0x4] sm:$0xf]  ;;  %v1108_v4 = vrot.slane %v1107_v26, 4  ;;  %v1115_v51 = vrot.slane %v1114_v25, 4 }
  0xad   : > { %v1823_v41 = vpop.eup %1822  ;;  %v1126_v52 = vrot.slane %v1125_v38, 1  ;;  %v1436_v43 = vsel %vm474_vm0, %v1426_v42, -inf  ;;  %v870_v30 = vmax.f32 %v445_v22, %v862_v27  ;;  %v832_v46 = vmul.f32 %v2185_v60, %v816_v32 }
  0xae   : > { %v861_v45 = vmax.f32 %v829_v19, %v845_v28  ;;  %1437 = vmax.xlane.f32.xlu1 %v1436_v43  ;;  %v1425_v61 = vld [vmem:[#allocation3] sm:$0xf]  ;;  %1832 = vrcp.f32 %v764_v31  ;;  %v1132_v47 = vadd.f32 %v1131_v1, %v1130_v20  ;;  %v1109_v48 = vadd.f32 %v1108_v4, %v1107_v26  ;;  %v446_v19 = vld [vmem:[#allocation3 + $0x10] sm:$0xf] }
  0xaf   : > { %v1127_v15 = vadd.f32 %v1126_v52, %v1125_v38  ;;  %v1825_v49 = vpop.eup %1824  ;;  %v1433_v50 = vsel %vm474_vm0, %v1425_v61, -inf  ;;  %878 = vst [vmem:[#allocation3 + $0xc] sm:$0xf] %v870_v30  ;;  %v848_v56 = vrot.slane %v832_v46, 4  ;;  %v1116_v9 = vadd.f32 %v1115_v51, %v1114_v25 }
  0xb0   : > { %v869_v55 = vmax.f32 %v444_v23, %v861_v45  ;;  %1434 = vmax.xlane.f32.xlu0 %v1433_v50  ;;  %v815_v36 = vcombine.low %v1823_v41, %v1825_v49  ;;  %v1133_v62 = vrot.slane %v1132_v47, 1  ;;  %v1110_v59 = vrot.slane %v1109_v48, 2 }
  0xb1   : > { %1834 = vrcp.f32 %v1127_v15  ;;  %v864_v60 = vmax.f32 %v832_v46, %v848_v56  ;;  %v1117_v63 = vrot.slane %v1116_v9, 2  ;;  %v1094_v0 = vcombine.high %v2145_v37, %v2145_v37 }
  0xb2   : > { %877 = vst [vmem:[#allocation3 + $0x8] sm:$0xf] %v869_v55  ;;  %v1149_v14 = vsel %vm474_vm0, %v2145_v37, 0.0  ;;  %v831_v3 = vmul.f32 %v2206_v54, %v815_v36  ;;  %v1134_v5 = vadd.f32 %v1133_v62, %v1132_v47  ;;  %v1111_v6 = vadd.f32 %v1110_v59, %v1109_v48  ;;  %v449_v48 = vld [vmem:[#allocation3 + $0x1c] sm:$0xf] }
  0xb3   : > { %v1150_v7 = vrot.slane %v1149_v14, 4  ;;  %v1827_v8 = vpop.eup %1826  ;;  %v872_v10 = vmax.f32 %v447_v57, %v864_v60  ;;  %v1118_v11 = vadd.f32 %v1117_v63, %v1116_v9  ;;  %v1156_v12 = vsel %vm474_vm0, %v1094_v0, 0.0 }
  0xb4   : > { %v1093_v2 = vcombine.high %v2098_v29, %v2098_v29  ;;  %v847_v35 = vrot.slane %v831_v3, 4  ;;  %1836 = vrcp.f32 %v1134_v5  ;;  %v1112_v16 = vrot.slane %v1111_v6, 1 }
  0xb5   : > { %v1151_v17 = vadd.f32 %v1150_v7, %v1149_v14  ;;  %v1829_v18 = vpop.eup %1828  ;;  %880 = vst [vmem:[#allocation3 + $0x14] sm:$0xf] %v872_v10  ;;  %v1119_v13 = vrot.slane %v1118_v11, 1  ;;  %v1157_v54 = vrot.slane %v1156_v12, 4  ;;  %v1135_v20 = vsel %vm474_vm0, %v2098_v29, 0.0 }
  0xb6   : > { %v1142_v21 = vsel %vm474_vm0, %v1093_v2, 0.0  ;;  %v1428_v22 = vld [vmem:[#allocation3 + $0xc] sm:$0xf]  ;;  %v863_v38 = vmax.f32 %v831_v3, %v847_v35  ;;  %v818_v26 = vcombine.low %v1827_v8, %v1829_v18  ;;  %v1113_v25 = vadd.f32 %v1112_v16, %v1111_v6 }
  0xb7   : > { %v1152_v27 = vrot.slane %v1151_v17, 2  ;;  %v1442_v28 = vsel %vm474_vm0, %v1428_v22, -inf  ;;  %v1120_v32 = vadd.f32 %v1119_v13, %v1118_v11  ;;  %v1158_v31 = vadd.f32 %v1157_v54, %v1156_v12 }
  0xb8   : > { %v1831_v23 = vpop.eup %1830  ;;  %v1136_v41 = vrot.slane %v1135_v20, 4  ;;  %1443 = vmax.xlane.f32.xlu1 %v1442_v28  ;;  %v871_v52 = vmax.f32 %v446_v19, %v863_v38  ;;  %v834_v1 = vmul.f32 %v2225_v44, %v818_v26  ;;  %1838 = vrcp.f32 %v1113_v25  ;;  %v448_v19 = vld [vmem:[#allocation3 + $0x18] sm:$0xf] }
  0xb9   : > { %v1427_v42 = vld [vmem:[#allocation3 + $0x8] sm:$0xf]  ;;  %v1153_v4 = vadd.f32 %v1152_v27, %v1151_v17  ;;  %1840 = vrcp.f32 %v1120_v32  ;;  %v1159_v43 = vrot.slane %v1158_v31, 2  ;;  %v1143_v61 = vrot.slane %v1142_v21, 4 }
  0xba   : > { %v1439_v51 = vsel %vm474_vm0, %v1427_v42, -inf  ;;  %v1137_v30 = vadd.f32 %v1136_v41, %v1135_v20  ;;  %879 = vst [vmem:[#allocation3 + $0x10] sm:$0xf] %v871_v52  ;;  %v850_v45 = vrot.slane %v834_v1, 4  ;;  %v1096_v15 = vcombine.high %v2198_v24, %v2198_v24 }
  0xbb   : > { %1440 = vmax.xlane.f32.xlu0 %v1439_v51  ;;  %v1154_v46 = vrot.slane %v1153_v4, 1  ;;  %v1833_v47 = vpop.eup %1832  ;;  %v1160_v49 = vadd.f32 %v1159_v43, %v1158_v31  ;;  %v1177_v44 = vsel %vm474_vm0, %v2198_v24, 0.0  ;;  %v1095_v55 = vcombine.high %v2217_v34, %v2217_v34 }
  0xbc   : > { %v1138_v50 = vrot.slane %v1137_v30, 2  ;;  %v1430_v56 = vld [vmem:[#allocation3 + $0x14] sm:$0xf]  ;;  %v866_v9 = vmax.f32 %v834_v1, %v850_v45  ;;  %v817_v57 = vcombine.low %v1831_v23, %v1833_v47  ;;  %v1144_v62 = vadd.f32 %v1143_v61, %v1142_v21 }
  0xbd   : > { %v1155_v36 = vadd.f32 %v1154_v46, %v1153_v4  ;;  %v1448_v60 = vsel %vm474_vm0, %v1430_v56, -inf  ;;  %v1161_v63 = vrot.slane %v1160_v49, 1  ;;  %v1178_v14 = vrot.slane %v1177_v44, 4 }
  0xbe   : > { %v1835_v59 = vpop.eup %1834  ;;  %v1139_v0 = vadd.f32 %v1138_v50, %v1137_v30  ;;  %1449 = vmax.xlane.f32.xlu1 %v1448_v60  ;;  %v874_v3 = vmax.f32 %v449_v48, %v866_v9  ;;  %v833_v5 = vmul.f32 %v2245_v33, %v817_v57  ;;  %v1145_v6 = vrot.slane %v1144_v62, 2 }
  0xbf   : > { %1842 = vrcp.f32 %v1155_v36  ;;  %v1162_v7 = vadd.f32 %v1161_v63, %v1160_v49  ;;  %v1179_v10 = vadd.f32 %v1178_v14, %v1177_v44  ;;  %v1184_v11 = vsel %vm474_vm0, %v1096_v15, 0.0 }
  0xc0   : > { %v1140_v8 = vrot.slane %v1139_v0, 1  ;;  %882 = vst [vmem:[#allocation3 + $0x1c] sm:$0xf] %v874_v3  ;;  %v849_v12 = vrot.slane %v833_v5, 4  ;;  %v1146_v2 = vadd.f32 %v1145_v6, %v1144_v62  ;;  %v1185_v35 = vrot.slane %v1184_v11, 4 }
  0xc1   : > { %v1163_v16 = vsel %vm474_vm0, %v2217_v34, 0.0  ;;  %v1837_v17 = vpop.eup %1836  ;;  %v1429_v18 = vld [vmem:[#allocation3 + $0x10] sm:$0xf]  ;;  %1844 = vrcp.f32 %v1162_v7  ;;  %v1180_v33 = vrot.slane %v1179_v10, 2  ;;  %v1170_v31 = vsel %vm474_vm0, %v1095_v55, 0.0 }
  0xc2   : > { %v1141_v13 = vadd.f32 %v1140_v8, %v1139_v0  ;;  %v1164_v54 = vrot.slane %v1163_v16, 4  ;;  %v1445_v20 = vsel %vm474_vm0, %v1429_v18, -inf  ;;  %v865_v21 = vmax.f32 %v833_v5, %v849_v12  ;;  %v883_v6 = vld [vmem:[#allocation4] sm:$0xf] }
  0xc3   : > { %v1252_v22 = vcombine.low %v1835_v59, %v1837_v17  ;;  %v1147_v38 = vrot.slane %v1146_v2, 1  ;;  %1446 = vmax.xlane.f32.xlu0 %v1445_v20  ;;  %v1181_v26 = vadd.f32 %v1180_v33, %v1179_v10  ;;  %v1186_v25 = vadd.f32 %v1185_v35, %v1184_v11 }
  0xc4   : > { %1846 = vrcp.f32 %v1141_v13  ;;  %v1165_v27 = vadd.f32 %v1164_v54, %v1163_v16  ;;  %v873_v23 = vmax.f32 %v448_v19, %v865_v21  ;;  %v1171_v4 = vrot.slane %v1170_v31, 4 }
  0xc5   : > { %v1268_v28 = vmul.f32 %v2175_v40, %v1252_v22  ;;  %v1148_v32 = vadd.f32 %v1147_v38, %v1146_v2  ;;  %v1839_v41 = vpop.eup %1838  ;;  %v1182_v42 = vrot.slane %v1181_v26, 1  ;;  %v1187_v52 = vrot.slane %v1186_v25, 2  ;;  %v884_v40 = vld [vmem:[#allocation4 + $0x4] sm:$0xf]  ;;  %v1342_v21 = vpop.xlane.xlu1 %1341 }
  0xc6   : > { %v1166_v1 = vrot.slane %v1165_v27, 2  ;;  %v1841_v51 = vpop.eup %1840  ;;  %881 = vst [vmem:[#allocation3 + $0x18] sm:$0xf] %v873_v23  ;;  %v1098_v30 = vcombine.high %v2238_v39, %v2238_v39  ;;  %v1205_v45 = vsel %vm474_vm0, %v2238_v39, 0.0  ;;  %v1172_v44 = vadd.f32 %v1171_v4, %v1170_v31 }
  0xc7   : > { %v1284_v43 = vrot.slane %v1268_v28, 4  ;;  %1848 = vrcp.f32 %v1148_v32  ;;  %v1432_v46 = vld [vmem:[#allocation3 + $0x1c] sm:$0xf]  ;;  %v1251_v61 = vcombine.low %v1839_v41, %v1841_v51  ;;  %v1183_v15 = vadd.f32 %v1182_v42, %v1181_v26 }
  0xc8   : > { %v1188_v47 = vadd.f32 %v1187_v52, %v1186_v25  ;;  %v1167_v48 = vadd.f32 %v1166_v1, %v1165_v27  ;;  %v1454_v49 = vsel %vm474_vm0, %v1432_v46, -inf  ;;  %v1206_v55 = vrot.slane %v1205_v45, 4  ;;  %v1336_v46 = vpop.xlane.xlu0 %1335 }
  0xc9   : > { %v1300_v50 = vmax.f32 %v1268_v28, %v1284_v43  ;;  %1455 = vmax.xlane.f32.xlu1 %v1454_v49  ;;  %v1267_v56 = vmul.f32 %v2122_v53, %v1251_v61  ;;  %1850 = vrcp.f32 %v1183_v15  ;;  %v1173_v62 = vrot.slane %v1172_v44, 2  ;;  %v886_v61 = vld [vmem:[#allocation4 + $0xc] sm:$0xf] }
  0xca   : > { %v1189_v9 = vrot.slane %v1188_v47, 1  ;;  %v1168_v57 = vrot.slane %v1167_v48, 1  ;;  %v1207_v59 = vadd.f32 %v1206_v55, %v1205_v45  ;;  %v1212_v60 = vsel %vm474_vm0, %v1098_v30, 0.0 }
  0xcb   : > { %v1308_v36 = vmax.f32 %v884_v40, %v1300_v50  ;;  %v1283_v0 = vrot.slane %v1267_v56, 4  ;;  %v1213_v5 = vrot.slane %v1212_v60, 4  ;;  %v1174_v7 = vadd.f32 %v1173_v62, %v1172_v44 }
  0xcc   : > { %v1843_v63 = vpop.eup %1842  ;;  %v1190_v14 = vadd.f32 %v1189_v9, %v1188_v47  ;;  %v1169_v3 = vadd.f32 %v1168_v57, %v1167_v48  ;;  %v1208_v8 = vrot.slane %v1207_v59, 2  ;;  %v1097_v53 = vcombine.high %v2252_v58, %v2252_v58 }
  0xcd   : > { %1316 = vst [vmem:[#allocation4 + $0x4] sm:$0xf] %v1308_v36  ;;  %v1191_v10 = vsel %vm474_vm0, %v2252_v58, 0.0  ;;  %v1431_v11 = vld [vmem:[#allocation3 + $0x18] sm:$0xf]  ;;  %v1299_v12 = vmax.f32 %v1267_v56, %v1283_v0  ;;  %v1214_v2 = vadd.f32 %v1213_v5, %v1212_v60  ;;  %v1175_v18 = vrot.slane %v1174_v7, 1 }
  0xce   : > { %1852 = vrcp.f32 %v1190_v14  ;;  %v1192_v35 = vrot.slane %v1191_v10, 4  ;;  %v1845_v16 = vpop.eup %1844  ;;  %v1451_v17 = vsel %vm474_vm0, %v1431_v11, -inf  ;;  %v1209_v19 = vadd.f32 %v1208_v8, %v1207_v59  ;;  %v885_v5 = vld [vmem:[#allocation4 + $0x8] sm:$0xf] }
  0xcf   : > { %1854 = vrcp.f32 %v1169_v3  ;;  %1452 = vmax.xlane.f32.xlu0 %v1451_v17  ;;  %v1307_v13 = vmax.f32 %v883_v6, %v1299_v12  ;;  %v1254_v33 = vcombine.low %v1843_v63, %v1845_v16  ;;  %v1215_v54 = vrot.slane %v1214_v2, 2 }
  0xd0   : > { %v1193_v20 = vadd.f32 %v1192_v35, %v1191_v10  ;;  %v1176_v38 = vadd.f32 %v1175_v18, %v1174_v7  ;;  %v1210_v26 = vrot.slane %v1209_v19, 1  ;;  %v1198_v25 = vsel %vm474_vm0, %v1097_v53, 0.0 }
  0xd1   : > { %v1847_v22 = vpop.eup %1846  ;;  %v1374_v27 = vlaneseq  ;;  %1315 = vst [vmem:[#allocation4] sm:$0xf] %v1307_v13  ;;  %v1270_v23 = vmul.f32 %v2145_v37, %v1254_v33  ;;  %v1216_v28 = vadd.f32 %v1215_v54, %v1214_v2  ;;  %v1199_v31 = vrot.slane %v1198_v25, 4 }
  0xd2   : > { %v1194_v32 = vrot.slane %v1193_v20, 2  ;;  %1856 = vrcp.f32 %v1176_v38  ;;  %v1211_v41 = vadd.f32 %v1210_v26, %v1209_v19  ;;  %v1345_v44 = vpop.xlane.xlu1 %1344  ;;  %vm1416_vm1 = vcmask 24576   ;;  %v888_v19 = vld [vmem:[#allocation4 + $0x14] sm:$0xf] }
  0xd3   : > { %v1375_v42 = vand.u32 127, %v1374_v27  ;;  %v1377_v52 = vshrl.u32 %v1374_v27, 7  ;;  %v1286_v51 = vrot.slane %v1270_v23, 4  ;;  %v1217_v43 = vrot.slane %v1216_v28, 1 }
  0xd4   : > { %v1849_v1 = vpop.eup %1848  ;;  %v1514_v4 = vld [vmem:[#allocation4 + $0x4] sm:$0xf]  ;;  %v1195_v30 = vadd.f32 %v1194_v32, %v1193_v20  ;;  %v1200_v45 = vadd.f32 %v1199_v31, %v1198_v25  ;;  %1858 = vrcp.f32 %v1211_v41  ;;  %v1360_v9 = vmul.f32 0.00390625, %v1342_v21 }
  0xd5   : > { %v1524_v40 = vsel %vm474_vm0, %v1514_v4, -inf  ;;  %v1253_v15 = vcombine.low %v1847_v22, %v1849_v1  ;;  %v2321_v37 = vsub.s32 %v1375_v42, %v1377_v52  ;;  %v1302_v47 = vmax.f32 %v1270_v23, %v1286_v51  ;;  %v890_v51 = vld [vmem:[#allocation4 + $0x1c] sm:$0xf] }
  0xd6   : > { %1525 = vmax.xlane.f32.xlu1 %v1524_v40  ;;  %v1218_v48 = vadd.f32 %v1217_v43, %v1216_v28  ;;  %v1196_v49 = vrot.slane %v1195_v30, 1  ;;  %v1201_v50 = vrot.slane %v1200_v45, 2  ;;  %v1851_v55 = vpop.eup %1850  ;;  %v1358_v57 = vmul.f32 0.00390625, %v1336_v46  ;;  %v887_v28 = vld [vmem:[#allocation4 + $0x10] sm:$0xf] }
  0xd7   : > { %v1269_v56 = vmul.f32 %v2098_v29, %v1253_v15  ;;  %v1310_v36 = vmax.f32 %v886_v61, %v1302_v47  ;;  %v1387_v0 = vrot.slane %v1360_v9, %v2321_v37  ;;  %v1361_v14 = vmul.f32 0.00390625, %v1345_v44 }
  0xd8   : > { %1860 = vrcp.f32 %v1218_v48  ;;  %v1197_v62 = vadd.f32 %v1196_v49, %v1195_v30  ;;  %v1202_v59 = vadd.f32 %v1201_v50, %v1200_v45  ;;  %v1513_v60 = vld [vmem:[#allocation4] sm:$0xf]  ;;  %v1379_v29 = vrot.slane %v1358_v57, %v2321_v37  ;;  %v889_v49 = vld [vmem:[#allocation4 + $0x18] sm:$0xf] }
  0xd9   : > { %v1285_v63 = vrot.slane %v1269_v56, 4  ;;  %v1521_v3 = vsel %vm474_vm0, %v1513_v60, -inf  ;;  %1318 = vst [vmem:[#allocation4 + $0xc] sm:$0xf] %v1310_v36  ;;  %1419 = vst.msk [vmem:[%s2327_s9 + $0x8] sm:$0x1] %vm1416_vm1, %v1387_v0  ;;  %v1391_v53 = vrot.slane %v1361_v14, %v2321_v37 }
  0xda   : > { %v1203_v6 = vrot.slane %v1202_v59, 1  ;;  %1522 = vmax.xlane.f32.xlu0 %v1521_v3  ;;  %1417 = vst.msk [vmem:[%s2327_s9] sm:$0x1] %vm1416_vm1, %v1379_v29  ;;  %1862 = vrcp.f32 %v1197_v62 }
  0xdb   : > { %v1853_v7 = vpop.eup %1852  ;;  %v1301_v8 = vmax.f32 %v1269_v56, %v1285_v63  ;;  %1420 = vst.msk [vmem:[%s2327_s9 + $0xc] sm:$0x1] %vm1416_vm1, %v1391_v53 }
  0xdc   : > { %v1855_v10 = vpop.eup %1854  ;;  %v1256_v11 = vcombine.low %v1851_v55, %v1853_v7  ;;  %v1204_v12 = vadd.f32 %v1203_v6, %v1202_v59 }
  0xdd   : > { %v1309_v2 = vmax.f32 %v885_v5, %v1301_v8 }
  0xde   : > { %v1272_v35 = vmul.f32 %v2198_v24, %v1256_v11  ;;  %1864 = vrcp.f32 %v1204_v12 }
  0xdf   : > { %1317 = vst [vmem:[#allocation4 + $0x8] sm:$0xf] %v1309_v2  ;;  %v1857_v16 = vpop.eup %1856 }
  0xe0   : > { %v1288_v17 = vrot.slane %v1272_v35, 4  ;;  %v1516_v18 = vld [vmem:[#allocation4 + $0xc] sm:$0xf]  ;;  %v1255_v13 = vcombine.low %v1855_v10, %v1857_v16 }
  0xe1   : > { %v1339_v33 = vpop.xlane.xlu0 %1338  ;;  %v1859_v54 = vpop.eup %1858  ;;  %v1530_v20 = vsel %vm474_vm0, %v1516_v18, -inf }
  0xe2   : > { %v1304_v21 = vmax.f32 %v1272_v35, %v1288_v17  ;;  %v1359_v22 = vmul.f32 0.00390625, %v1339_v33  ;;  %1531 = vmax.xlane.f32.xlu1 %v1530_v20  ;;  %v1271_v38 = vmul.f32 %v2217_v34, %v1255_v13 }
  0xe4   : > { %v1312_v26 = vmax.f32 %v888_v19, %v1304_v21  ;;  %v1383_v24 = vrot.slane %v1359_v22, %v2321_v37  ;;  %v1287_v27 = vrot.slane %v1271_v38, 4 }
  0xe5   : > { %v1861_v25 = vpop.eup %1860 }
  0xe6   : > { %v1515_v23 = vld [vmem:[#allocation4 + $0x8] sm:$0xf]  ;;  %1320 = vst [vmem:[#allocation4 + $0x14] sm:$0xf] %v1312_v26  ;;  %v1258_v32 = vcombine.low %v1859_v54, %v1861_v25  ;;  %1418 = vst.msk [vmem:[%s2327_s9 + $0x4] sm:$0x1] %vm1416_vm1, %v1383_v24  ;;  %v1303_v41 = vmax.f32 %v1271_v38, %v1287_v27 }
  0xe7   : > { %v1527_v31 = vsel %vm474_vm0, %v1515_v23, -inf  ;;  %v1863_v52 = vpop.eup %1862 }
  0xe8   : > { %1528 = vmax.xlane.f32.xlu0 %v1527_v31  ;;  %v1274_v42 = vmul.f32 %v2238_v39, %v1258_v32  ;;  %v1311_v1 = vmax.f32 %v887_v28, %v1303_v41 }
  0xea   : > { %v1290_v34 = vrot.slane %v1274_v42, 4  ;;  %1319 = vst [vmem:[#allocation4 + $0x10] sm:$0xf] %v1311_v1 }
  0xeb   : > { %v1865_v4 = vpop.eup %1864  ;;  %v1351_v45 = vpop.xlane.xlu1 %1350 }
  0xec   : > { %v1306_v43 = vmax.f32 %v1274_v42, %v1290_v34  ;;  %v1257_v30 = vcombine.low %v1863_v52, %v1865_v4  ;;  %v1363_v40 = vmul.f32 0.00390625, %v1351_v45 }
  0xed   : > { %v1518_v46 = vld [vmem:[#allocation4 + $0x14] sm:$0xf] }
  0xee   : > { %v1536_v61 = vsel %vm474_vm0, %v1518_v46, -inf  ;;  %v1314_v15 = vmax.f32 %v890_v51, %v1306_v43  ;;  %v1273_v47 = vmul.f32 %v2252_v58, %v1257_v30  ;;  %v1399_v39 = vrot.slane %v1363_v40, %v2321_v37 }
  0xef   : > { %1537 = vmax.xlane.f32.xlu1 %v1536_v61 }
  0xf0   : > { %1322 = vst [vmem:[#allocation4 + $0x1c] sm:$0xf] %v1314_v15  ;;  %v1289_v48 = vrot.slane %v1273_v47, 4  ;;  %1422 = vst.msk [vmem:[%s2327_s9 + $0x14] sm:$0x1] %vm1416_vm1, %v1399_v39 }
  0xf1   : > { %v1517_v50 = vld [vmem:[#allocation4 + $0x10] sm:$0xf] }
  0xf2   : > { %v1305_v44 = vmax.f32 %v1273_v47, %v1289_v48  ;;  %v1533_v55 = vsel %vm474_vm0, %v1517_v50, -inf }
  0xf3   : > { %1534 = vmax.xlane.f32.xlu0 %v1533_v55 }
  0xf4   : > { %v1313_v56 = vmax.f32 %v889_v49, %v1305_v44 }
  0xf6   : > { %1321 = vst [vmem:[#allocation4 + $0x18] sm:$0xf] %v1313_v56  ;;  %v1348_v57 = vpop.xlane.xlu0 %1347 }
  0xf7   : > { %v1520_v9 = vld [vmem:[#allocation4 + $0x1c] sm:$0xf]  ;;  %v1362_v36 = vmul.f32 0.00390625, %v1348_v57 }
  0xf8   : > { %v1542_v58 = vsel %vm474_vm0, %v1520_v9, -inf }
  0xf9   : > { %1543 = vmax.xlane.f32.xlu1 %v1542_v58  ;;  %v1395_v62 = vrot.slane %v1362_v36, %v2321_v37 }
  0xfb   : > { %1421 = vst.msk [vmem:[%s2327_s9 + $0x10] sm:$0x1] %vm1416_vm1, %v1395_v62 }
  0xfd   : > { %v1519_v59 = vld [vmem:[#allocation4 + $0x18] sm:$0xf] }
  0xfe   : > { %v1539_v60 = vsel %vm474_vm0, %v1519_v59, -inf }
  0xff   : > { %1540 = vmax.xlane.f32.xlu0 %v1539_v60 }
 0x105   : > { %v1357_v63 = vpop.xlane.xlu1 %1356 }
 0x106   : > { %v1365_v0 = vmul.f32 0.00390625, %v1357_v63 }
 0x108   : > { %v1407_v29 = vrot.slane %v1365_v0, %v2321_v37 }
 0x10a   : > { %1424 = vst.msk [vmem:[%s2327_s9 + $0x1c] sm:$0x1] %vm1416_vm1, %v1407_v29 }
 0x110   : > { %v1354_v14 = vpop.xlane.xlu0 %1353 }
 0x111   : > { %v1364_v3 = vmul.f32 0.00390625, %v1354_v14 }
 0x113   : > { %v1403_v5 = vrot.slane %v1364_v3, %v2321_v37 }
 0x115   : > { %1423 = vst.msk [vmem:[%s2327_s9 + $0x18] sm:$0x1] %vm1416_vm1, %v1403_v5 }
 0x137   : > { %v1438_v6 = vpop.xlane.xlu1 %1437 }
 0x138   : > { %v1472_v7 = vrot.slane %v1438_v6, %v2321_v37 }
 0x139   : > { %v1435_v8 = vpop.xlane.xlu0 %1434 }
 0x13a   : > { %1506 = vst.msk [vmem:[%s2327_s9 + $0x5] sm:$0x1] %vm1416_vm1, %v1472_v7  ;;  %v1468_v53 = vrot.slane %v1435_v8, %v2321_v37 }
 0x13c   : > { %1505 = vst.msk [vmem:[%s2327_s9 + $0x1] sm:$0x1] %vm1416_vm1, %v1468_v53 }
 0x141   : > { %v1444_v10 = vpop.xlane.xlu1 %1443 }
 0x142   : > { %v1480_v11 = vrot.slane %v1444_v10, %v2321_v37 }
 0x144   : > { %v1441_v12 = vpop.xlane.xlu0 %1440  ;;  %1508 = vst.msk [vmem:[%s2327_s9 + $0xd] sm:$0x1] %vm1416_vm1, %v1480_v11 }
 0x145   : > { %v1476_v2 = vrot.slane %v1441_v12, %v2321_v37 }
 0x147   : > { %1507 = vst.msk [vmem:[%s2327_s9 + $0x9] sm:$0x1] %vm1416_vm1, %v1476_v2  ;;  %v1450_v35 = vpop.xlane.xlu1 %1449 }
 0x148   : > { %v1488_v16 = vrot.slane %v1450_v35, %v2321_v37 }
 0x14a   : > { %1510 = vst.msk [vmem:[%s2327_s9 + $0x15] sm:$0x1] %vm1416_vm1, %v1488_v16 }
 0x14c   : > { %v1447_v17 = vpop.xlane.xlu0 %1446 }
 0x14d   : > { %v1484_v18 = vrot.slane %v1447_v17, %v2321_v37 }
 0x14f   : > { %1509 = vst.msk [vmem:[%s2327_s9 + $0x11] sm:$0x1] %vm1416_vm1, %v1484_v18 }
 0x152   : > { %v1456_v19 = vpop.xlane.xlu1 %1455 }
 0x153   : > { %v1496_v13 = vrot.slane %v1456_v19, %v2321_v37 }
 0x155   : > { %1512 = vst.msk [vmem:[%s2327_s9 + $0x1d] sm:$0x1] %vm1416_vm1, %v1496_v13 }
 0x158   : > { %v1453_v33 = vpop.xlane.xlu0 %1452 }
 0x159   : > { %v1492_v54 = vrot.slane %v1453_v33, %v2321_v37 }
 0x15b   : > { %1511 = vst.msk [vmem:[%s2327_s9 + $0x19] sm:$0x1] %vm1416_vm1, %v1492_v54 }
 0x15f   : > { %v1526_v20 = vpop.xlane.xlu1 %1525 }
 0x160   : > { %v1560_v21 = vrot.slane %v1526_v20, %v2321_v37 }
 0x162   : > { %1594 = vst.msk [vmem:[%s2327_s9 + $0x6] sm:$0x1] %vm1416_vm1, %v1560_v21 }
 0x163   : > { %v1523_v22 = vpop.xlane.xlu0 %1522 }
 0x164   : > { %v1556_v38 = vrot.slane %v1523_v22, %v2321_v37 }
 0x166   : > { %1593 = vst.msk [vmem:[%s2327_s9 + $0x2] sm:$0x1] %vm1416_vm1, %v1556_v38 }
 0x16b   : > { %v1532_v26 = vpop.xlane.xlu1 %1531 }
 0x16c   : > { %v1568_v24 = vrot.slane %v1532_v26, %v2321_v37 }
 0x16e   : > { %1596 = vst.msk [vmem:[%s2327_s9 + $0xe] sm:$0x1] %vm1416_vm1, %v1568_v24 }
 0x171   : > { %v1529_v25 = vpop.xlane.xlu0 %1528 }
 0x172   : > { %v1564_v27 = vrot.slane %v1529_v25, %v2321_v37 }
 0x174   : > { %1595 = vst.msk [vmem:[%s2327_s9 + $0xa] sm:$0x1] %vm1416_vm1, %v1564_v27 }
 0x178   : > { %v1538_v23 = vpop.xlane.xlu1 %1537 }
 0x179   : > { %v1576_v28 = vrot.slane %v1538_v23, %v2321_v37 }
 0x17b   : > { %1598 = vst.msk [vmem:[%s2327_s9 + $0x16] sm:$0x1] %vm1416_vm1, %v1576_v28 }
 0x17c   : > { %v1535_v32 = vpop.xlane.xlu0 %1534 }
 0x17d   : > { %v1572_v31 = vrot.slane %v1535_v32, %v2321_v37 }
 0x17f   : > { %1597 = vst.msk [vmem:[%s2327_s9 + $0x12] sm:$0x1] %vm1416_vm1, %v1572_v31 }
 0x182   : > { %v1544_v41 = vpop.xlane.xlu1 %1543 }
 0x183   : > { %v1584_v42 = vrot.slane %v1544_v41, %v2321_v37 }
 0x185   : > { %1600 = vst.msk [vmem:[%s2327_s9 + $0x1e] sm:$0x1] %vm1416_vm1, %v1584_v42 }
 0x188   : > { %v1541_v52 = vpop.xlane.xlu0 %1540 }
 0x189   : > { %v1580_v1 = vrot.slane %v1541_v52, %v2321_v37 }
 0x18b   : > { %1599 = vst.msk [vmem:[%s2327_s9 + $0x1a] sm:$0x1] %vm1416_vm1, %v1580_v1 }
 0x18c PF: > { %s12_s13 = sadd.s32 1, %s1904_s13   ;;  %s2431_s9 = smov %s1892_s10 }
 0x18d   : > { %p9_p10 = scmp.ge.s32.totalorder %s12_s13, 4   ;;  %s2432_s10 = smov %s1957_s17 }
 0x18e   : > { %s2433_s11 = smov %s1900_s12  ;;  %s2434_s12 = smov %s2436_s14 }
 0x18f   :  { %11 = sbr.rel (!%p9_p10) target bundleno = 3 (0x3), region = 113 }

</bundles_post_ra>
